<compile_context>
chip_gen: v7x
topology: tpu7x:2x2x1
jax: 0.10.0
libtpu: 0.0.40
codegen_flags: <defaults>
</compile_context>

<pallas_src>
import math

import jax
import jax.numpy as jnp
from jax.experimental import pallas as pl
from jax.experimental.pallas import tpu as pltpu


# ---------------------------------------------------------------------------
# Slab packing (wrapper side): one lane-padded f32 slab, 8-row-aligned items.
# ---------------------------------------------------------------------------

def _pack(items):
    norm = []
    for name, a in items:
        a = jnp.asarray(a, jnp.float32)
        if a.ndim == 1:
            a = a.reshape(1, -1)
        norm.append((name, a))
    lane_w = max(a.shape[1] for _, a in norm)
    blocks, offs, row = [], {}, 0
    for name, a in norm:
        r, c = a.shape
        offs[name] = (row, r, c)                      # Python ints -> static slices
        a = jnp.pad(a, ((0, (-r) % 8), (0, lane_w - c)))
        blocks.append(a)
        row += a.shape[0]
    return jnp.concatenate(blocks, axis=0), offs


# ---------------------------------------------------------------------------
# Wrapper-side parameter folds (array math only; exact).
# ---------------------------------------------------------------------------

def _combine_decomp(dp, C):
    """softmax(freq_weights)-weighted sum of the centered depthwise convs ->
    one (K, C) kernel + (1, C) bias.  Exact (all convs are 'same' centered)."""
    scales = dp["scales"]
    K = max(scales)
    wsm = jax.nn.softmax(dp["freq_weights"])
    comb_w = jnp.zeros((K, C), jnp.float32)
    comb_b = jnp.zeros((1, C), jnp.float32)
    for i, k in enumerate(scales):
        off = (K - k) // 2
        comb_w = comb_w.at[off:off + k, :].add(wsm[i] * dp["conv_w"][i])
        comb_b = comb_b + wsm[i] * dp["conv_b"][i][None, :]
    return comb_w, comb_b


def _decomp_masked_weights(comb_w, freq_filter, B, L, R):
    """Pre-masked per-tap weights for the stacked-batch layout.
    MW[s, t, :] = ff * comb_w[P + d]  if the shifted source stays inside row t's
    sequence, else 0 (d = s - R).  Stored flattened as (n_taps*B*L, C)."""
    K, C = comb_w.shape
    P = K // 2
    BL = B * L
    ff = jnp.asarray(freq_filter, jnp.float32).reshape(())
    tl = jnp.arange(BL) % L
    rows = []
    for s in range(2 * R + 1):
        d = s - R
        ok = ((tl + d >= 0) & (tl + d < L)).astype(jnp.float32)[:, None]   # (BL,1)
        rows.append(ok * comb_w[P + d][None, :])
    return ff * jnp.concatenate(rows, axis=0)                               # (taps*BL, C)


def _pos_embedding(ap, L, B):
    pos = (jnp.arange(L, dtype=jnp.float32) / L)[:, None]
    h = jnp.maximum(pos @ ap["pos_w1"] + ap["pos_b1"], 0.0)
    pe = h @ ap["pos_w2"] + ap["pos_b2"]
    return jnp.tile(pe, (B, 1))                                             # (B*L, D)


_LAYER_KEYS = ("pos", "n1g", "n1b", "wq", "bq", "wk", "bk", "wv", "bv", "wo", "bo",
               "gwx", "gwr", "gb", "d_mw", "d_b", "n2g", "n2b",
               "w1a", "b1a", "w1b", "b1b", "w2", "b2")
_GLOBAL_KEYS = ("attn_bias", "m_prev", "m_next", "d0_mw", "d0_b",
                "emb_w0", "emb_w1", "emb_w2", "emb_wt", "head_w", "head_b")


# ---------------------------------------------------------------------------
# Fused kernel factory: the whole forecast forward in one kernel body.
# ---------------------------------------------------------------------------

def _make_kernel(cfg, goff, hm_offs, loffs):
    B, L, D = cfg["B"], cfg["L"], cfg["D"]
    BL = B * L
    n_heads, dec_in, mark_dim, R = cfg["n_heads"], cfg["dec_in"], cfg["mark_dim"], cfg["R"]
    n_taps = 2 * R + 1

    def kernel(data_ref, slab_ref, o_ref):
        def slab(off):                                    # static, sublane-aligned slice
            r, n, c = off
            return slab_ref[r:r + n, 0:c]

        def layernorm(x, g, b):
            m = jnp.mean(x, axis=-1, keepdims=True)
            v = jnp.mean(jnp.square(x - m), axis=-1, keepdims=True)
            return (x - m) * jax.lax.rsqrt(v + 1e-5) * g + b

        def gate(x, res, lo):
            logit = (jnp.dot(x, slab(lo["gwx"]), preferred_element_type=jnp.float32)
                     + jnp.dot(res, slab(lo["gwr"]), preferred_element_type=jnp.float32)
                     + slab(lo["gb"]))
            g = jax.nn.sigmoid(logit)
            return g * x + (1.0 - g) * res

        def decomp(x, mw_off, b_off, C):
            # trend[t] = b + sum_d maskedW[d, t, :] * x[(t + d) mod BL]
            r0 = mw_off[0]
            accs = [jnp.zeros((BL, C), jnp.float32) for _ in range(4)]
            for s in range(n_taps):                       # only taps touching real data
                d = s - R
                mw = slab_ref[r0 + s * BL: r0 + (s + 1) * BL, 0:C]
                xs = x if d == 0 else pltpu.roll(x, (-d) % BL, axis=0)
                accs[s % 4] = accs[s % 4] + xs * mw       # 4 partial accumulators
            trend = (accs[0] + accs[1]) + (accs[2] + accs[3]) + slab(b_off)
            return x - trend, trend

        x_dec = data_ref[0:BL, 0:dec_in]
        x_mark = data_ref[BL:2 * BL, 0:mark_dim]

        attn_bias = slab(goff["attn_bias"])               # (BL, BL) block-diag 0 / -1e9
        head_masks = [slab(o) for o in hm_offs]           # n_heads x (1, D) lane masks
        m_prev = slab(goff["m_prev"])                     # (BL, 1) row-boundary blends
        m_next = slab(goff["m_next"])

        # --- model-level adaptive decomposition of the decoder input ---
        seasonal0, trend0 = decomp(x_dec, goff["d0_mw"], goff["d0_b"], dec_in)

        # --- DataEmbedding_wo_pos: circular k=3 token conv + time features ---
        sp = (m_prev * pltpu.roll(seasonal0, 1, axis=0)
              + (1.0 - m_prev) * pltpu.roll(seasonal0, (1 - L) % BL, axis=0))
        sn = (m_next * pltpu.roll(seasonal0, BL - 1, axis=0)
              + (1.0 - m_next) * pltpu.roll(seasonal0, L - 1, axis=0))
        x = (jnp.dot(sp, slab(goff["emb_w0"]), preferred_element_type=jnp.float32)
             + jnp.dot(seasonal0, slab(goff["emb_w1"]), preferred_element_type=jnp.float32)
             + jnp.dot(sn, slab(goff["emb_w2"]), preferred_element_type=jnp.float32)
             + jnp.dot(x_mark, slab(goff["emb_wt"]), preferred_element_type=jnp.float32))

        # --- decoder stack (UltraEncoderLayer x d_layers) ---
        for lo in loffs:
            residual = x
            xn = layernorm(x, slab(lo["n1g"]), slab(lo["n1b"]))
            xp = xn + slab(lo["pos"])                     # pos-MLP precomputed outside
            q = jnp.dot(xp, slab(lo["wq"]), preferred_element_type=jnp.float32) + slab(lo["bq"])
            k = jnp.dot(xp, slab(lo["wk"]), preferred_element_type=jnp.float32) + slab(lo["bk"])
            v = jnp.dot(xp, slab(lo["wv"]), preferred_element_type=jnp.float32) + slab(lo["bv"])
            ctx = jnp.zeros((BL, D), jnp.float32)
            for h in range(n_heads):                      # no lane extracts: masked matmuls
                qm = q * head_masks[h]                    # temperature/sqrt(hd) folded in wq/bq
                s = jax.lax.dot_general(qm, k, (((1,), (1,)), ((), ())),
                                        preferred_element_type=jnp.float32)
                s = s + attn_bias
                s = s - jnp.max(s, axis=-1, keepdims=True)
                p = jnp.exp(s)
                p = p * pl.reciprocal(jnp.sum(p, axis=-1, keepdims=True), approx=True)
                ctx = ctx + jnp.dot(p, v * head_masks[h], preferred_element_type=jnp.float32)
            attn_out = (jnp.dot(ctx, slab(lo["wo"]), preferred_element_type=jnp.float32)
                        + slab(lo["bo"]))
            x = gate(attn_out, residual, lo)

            x, _ = decomp(x, lo["d_mw"], lo["d_b"], D)    # keep seasonal

            residual = x
            xn = layernorm(x, slab(lo["n2g"]), slab(lo["n2b"]))
            ha = jnp.dot(xn, slab(lo["w1a"]), preferred_element_type=jnp.float32) + slab(lo["b1a"])
            hb = jnp.dot(xn, slab(lo["w1b"]), preferred_element_type=jnp.float32) + slab(lo["b1b"])
            hg = ha * jax.nn.sigmoid(hb)                  # GLU, no lane split needed
            ffn = jnp.dot(hg, slab(lo["w2"]), preferred_element_type=jnp.float32) + slab(lo["b2"])
            x = gate(ffn, residual, lo)

        # --- prediction heads (softmax(head_weights) folded) + trend ---
        seas = (jnp.dot(x, slab(goff["head_w"]), preferred_element_type=jnp.float32)
                + slab(goff["head_b"]))
        o_ref[...] = seas + trend0                        # label_len == 0 -> full-length trend

    return kernel


# ---------------------------------------------------------------------------
# Wrapper: pack everything, call the single-step pallas_call.
# ---------------------------------------------------------------------------

def ultra_autoformer_forward(params, x_enc, x_mark_enc, x_dec, x_mark_dec,
                             pred_len, n_heads):
    # Encoder output / encoder_norm never feed the decoder or the heads in the
    # reference forecast (no cross-attention) -> dead compute, skipped.
    del x_enc, x_mark_enc
    f32 = jnp.float32
    B, Ld, dec_in = x_dec.shape
    mark_dim = x_mark_dec.shape[-1]
    assert Ld == pred_len, "label_len == 0 assumed (required by the reference's shape contract)"
    L, BL = Ld, B * Ld
    D = params["decoder_layers"][0]["attn"]["qkv_w"].shape[0]
    d_ff = params["decoder_layers"][0]["ffn_w2"].shape[0]
    c_out = params["prediction_heads"]["w"][0].shape[1]
    hd = D // n_heads
    K = max(params["decomp"]["scales"])
    R = min(L - 1, K // 2)

    items = []

    # static masks (precomputed so the kernel does no iota / integer-div work)
    tl = jnp.arange(BL) % L
    rid = jnp.arange(BL) // L
    items.append(("attn_bias", jnp.where(rid[:, None] == rid[None, :], 0.0, -1e9).astype(f32)))
    lane = jnp.arange(D)
    hm_names = []
    for h in range(n_heads):
        name = "hm%d" % h
        hm_names.append(name)
        items.append((name, ((lane >= h * hd) & (lane < (h + 1) * hd)).astype(f32).reshape(1, D)))
    items.append(("m_prev", (tl >= 1).astype(f32).reshape(BL, 1)))
    items.append(("m_next", (tl <= L - 2).astype(f32).reshape(BL, 1)))

    # model-level decomposition (freq_filter + softmax(freq_weights) folded)
    cw0, cb0 = _combine_decomp(params["decomp"], dec_in)
    items.append(("d0_mw", _decomp_masked_weights(cw0, params["decomp"]["freq_filter"], B, L, R)))
    items.append(("d0_b", cb0))

    # decoder embedding (circular conv taps + time-feature linear, no biases)
    tw = params["dec_emb"]["token_w"]
    items += [("emb_w0", tw[0:dec_in, :]), ("emb_w1", tw[dec_in:2 * dec_in, :]),
              ("emb_w2", tw[2 * dec_in:3 * dec_in, :]), ("emb_wt", params["dec_emb"]["time_w"])]

    # decoder layers
    for li, lp in enumerate(params["decoder_layers"]):
        ap = lp["attn"]
        scale = (ap["temperature"] / math.sqrt(hd)).reshape(())
        cw, cb = _combine_decomp(lp["decomp"], D)
        pre = "l%d_" % li
        items += [
            (pre + "pos", _pos_embedding(ap, L, B)),
            (pre + "n1g", lp["norm1_g"]), (pre + "n1b", lp["norm1_b"]),
            (pre + "wq", ap["qkv_w"][:, 0:D] * scale), (pre + "bq", ap["qkv_b"][0:D] * scale),
            (pre + "wk", ap["qkv_w"][:, D:2 * D]), (pre + "bk", ap["qkv_b"][D:2 * D]),
            (pre + "wv", ap["qkv_w"][:, 2 * D:3 * D]), (pre + "bv", ap["qkv_b"][2 * D:3 * D]),
            (pre + "wo", ap["out_w"]), (pre + "bo", ap["out_b"]),
            (pre + "gwx", lp["gate_w"][0:D, :]), (pre + "gwr", lp["gate_w"][D:2 * D, :]),
            (pre + "gb", lp["gate_b"]),
            (pre + "d_mw", _decomp_masked_weights(cw, lp["decomp"]["freq_filter"], B, L, R)),
            (pre + "d_b", cb),
            (pre + "n2g", lp["norm2_g"]), (pre + "n2b", lp["norm2_b"]),
            (pre + "w1a", lp["ffn_w1"][:, 0:d_ff]), (pre + "b1a", lp["ffn_b1"][0:d_ff]),
            (pre + "w1b", lp["ffn_w1"][:, d_ff:2 * d_ff]), (pre + "b1b", lp["ffn_b1"][d_ff:2 * d_ff]),
            (pre + "w2", lp["ffn_w2"]), (pre + "b2", lp["ffn_b2"]),
        ]

    # prediction heads: softmax(head_weights)-weighted sum folded into one linear
    wsm = jax.nn.softmax(params["head_weights"])
    head_w = sum(wsm[i] * params["prediction_heads"]["w"][i] for i in range(wsm.shape[0]))
    head_b = sum(wsm[i] * params["prediction_heads"]["b"][i] for i in range(wsm.shape[0]))
    items += [("head_w", head_w), ("head_b", head_b)]

    slab, offs = _pack(items)
    goff = {k: offs[k] for k in _GLOBAL_KEYS}
    hm_offs = [offs[n] for n in hm_names]
    loffs = [{k: offs["l%d_%s" % (li, k)] for k in _LAYER_KEYS}
             for li in range(len(params["decoder_layers"]))]

    # runtime data: x_dec and x_mark_dec stacked on sublanes into one small slab
    wd = max(dec_in, mark_dim)
    data = jnp.concatenate([
        jnp.pad(x_dec.reshape(BL, dec_in).astype(f32), ((0, 0), (0, wd - dec_in))),
        jnp.pad(x_mark_dec.reshape(BL, mark_dim).astype(f32), ((0, 0), (0, wd - mark_dim))),
    ], axis=0)                                            # (2*BL, wd)

    cfg = dict(B=B, L=L, D=D, n_heads=n_heads, dec_in=dec_in, mark_dim=mark_dim, R=R)
    kernel = _make_kernel(cfg, goff, hm_offs, loffs)

    out = pl.pallas_call(
        kernel,
        out_shape=jax.ShapeDtypeStruct((BL, c_out), f32),
        grid=(1,),                                        # single step: stacked batch
        in_specs=[pl.BlockSpec(tuple(data.shape), lambda i: (0, 0)),
                  pl.BlockSpec(tuple(slab.shape), lambda i: (0, 0))],
        out_specs=pl.BlockSpec((BL, c_out), lambda i: (0, 0)),
        compiler_params=pltpu.CompilerParams(dimension_semantics=("arbitrary",)),
    )(data, slab)
    return out.reshape(B, pred_len, c_out)


# ----------------------------- parameter init ------------------------------

def _init_linear(key, fan_in, fan_out):
    k1, k2 = jax.random.split(key)
    bound = 1.0 / math.sqrt(fan_in)
    w = jax.random.uniform(k1, (fan_in, fan_out), jnp.float32, -bound, bound)
    b = jax.random.uniform(k2, (fan_out,), jnp.float32, -bound, bound)
    return w, b


def _init_decomp_params(key, C, scales=(3, 7, 15, 31)):
    ws, bs = [], []
    for k in scales:
        key, k1, k2 = jax.random.split(key, 3)
        bound = 1.0 / math.sqrt(k)
        ws.append(jax.random.uniform(k1, (k, C), jnp.float32, -bound, bound))
        bs.append(jax.random.uniform(k2, (C,), jnp.float32, -bound, bound))
    return {"scales": list(scales),
            "freq_weights": jnp.ones((len(scales),), jnp.float32) / len(scales),
            "conv_w": ws, "conv_b": bs,
            "freq_filter": jnp.ones((1, 1, 1), jnp.float32)}


def _init_layer(key, d_model, d_ff):
    ks = jax.random.split(key, 8)
    pos_w1, pos_b1 = _init_linear(ks[0], 1, d_model // 4)
    pos_w2, pos_b2 = _init_linear(ks[1], d_model // 4, d_model)
    qkv_w, qkv_b = _init_linear(ks[2], d_model, 3 * d_model)
    out_w, out_b = _init_linear(ks[3], d_model, d_model)
    gate_w, gate_b = _init_linear(ks[4], 2 * d_model, d_model)
    ffn_w1, ffn_b1 = _init_linear(ks[5], d_model, 2 * d_ff)
    ffn_w2, ffn_b2 = _init_linear(ks[6], d_ff, d_model)
    return {
        "attn": {"pos_w1": pos_w1, "pos_b1": pos_b1, "pos_w2": pos_w2, "pos_b2": pos_b2,
                 "qkv_w": qkv_w, "qkv_b": qkv_b, "out_w": out_w, "out_b": out_b,
                 "temperature": jnp.ones((1,), jnp.float32)},
        "decomp": _init_decomp_params(ks[7], d_model),
        "gate_w": gate_w, "gate_b": gate_b,
        "ffn_w1": ffn_w1, "ffn_b1": ffn_b1, "ffn_w2": ffn_w2, "ffn_b2": ffn_b2,
        "norm1_g": jnp.ones((d_model,), jnp.float32), "norm1_b": jnp.zeros((d_model,), jnp.float32),
        "norm2_g": jnp.ones((d_model,), jnp.float32), "norm2_b": jnp.zeros((d_model,), jnp.float32),
    }


def _init_embedding(key, c_in, mark_dim, d_model):
    k1, k2 = jax.random.split(key)
    b_tok = 1.0 / math.sqrt(3 * c_in)
    token_w = jax.random.uniform(k1, (3 * c_in, d_model), jnp.float32, -b_tok, b_tok)
    b_tim = 1.0 / math.sqrt(mark_dim)
    time_w = jax.random.uniform(k2, (mark_dim, d_model), jnp.float32, -b_tim, b_tim)
    return {"token_w": token_w, "time_w": time_w}


# ---------------------------------- main -----------------------------------

if __name__ == "__main__":
    B, seq_len, pred_len = 2, 16, 8
    enc_in = dec_in = c_out = 4
    mark_dim = 4
    d_model, n_heads, d_ff = 32, 4, 64
    e_layers = d_layers = 1

    keys = jax.random.split(jax.random.PRNGKey(0), 20)

    head_ws, head_bs = [], []
    for i in range(3):
        w, b = _init_linear(keys[10 + i], d_model, c_out)
        head_ws.append(w)
        head_bs.append(b)

    params = {
        "embed_scale": jnp.ones((1,), jnp.float32),          # only scales the dead encoder path
        "lr_scale": jnp.ones((1,), jnp.float32),              # unused in forward
        "decomp": _init_decomp_params(keys[0], dec_in),
        # encoder params mirror the module but the encoder never feeds the decoder
        "enc_emb": _init_embedding(keys[1], enc_in, mark_dim, d_model),
        "dec_emb": _init_embedding(keys[2], dec_in, mark_dim, d_model),
        "encoder_layers": [_init_layer(keys[3 + i], d_model, d_ff) for i in range(e_layers)],
        "decoder_layers": [_init_layer(keys[6 + i], d_model, d_ff) for i in range(d_layers)],
        "enc_norm_g": jnp.ones((d_model,), jnp.float32),
        "enc_norm_b": jnp.zeros((d_model,), jnp.float32),
        "prediction_heads": {"w": head_ws, "b": head_bs},
        "head_weights": jnp.ones((3,), jnp.float32) / 3.0,
    }

    x_enc = jax.random.normal(keys[14], (B, seq_len, enc_in), jnp.float32)
    x_mark_enc = jax.random.normal(keys[15], (B, seq_len, mark_dim), jnp.float32)
    x_dec = jax.random.normal(keys[16], (B, pred_len, dec_in), jnp.float32)    # label_len = 0
    x_mark_dec = jax.random.normal(keys[17], (B, pred_len, mark_dim), jnp.float32)

    out = ultra_autoformer_forward(params, x_enc, x_mark_enc, x_dec, x_mark_dec,
                                   pred_len, n_heads)
    out = jax.block_until_ready(out)
    assert out.shape == (B, pred_len, c_out)
    assert bool(jnp.all(jnp.isfinite(out)))
    print("KERNEL_OK")
</pallas_src>

<mosaic_0001>
module attributes {stable_mosaic.version = 11 : i64} {
  func.func @kernel(%arg0: i32, %arg1: memref<32x4xf32, #tpu.memory_space<vmem>>, %arg2: memref<1080x64xf32, #tpu.memory_space<vmem>>, %arg3: memref<16x4xf32, #tpu.memory_space<vmem>>) attributes {dimension_semantics = [#tpu.dimension_semantics<arbitrary>], iteration_bounds = array<i64: 1>, scalar_prefetch = 0 : i64, scratch_operands = 0 : i64, tpu.core_type = #tpu.core_type<tc>, window_params = [{pipeline_mode = #tpu.pipeline_mode<synchronous>, transform_indices = @transform_0, window_bounds = array<i64: 32, 4>}, {pipeline_mode = #tpu.pipeline_mode<synchronous>, transform_indices = @transform_1, window_bounds = array<i64: 1080, 64>}, {pipeline_mode = #tpu.pipeline_mode<synchronous>, transform_indices = @transform_2, window_bounds = array<i64: 16, 4>}]} {
    %c0 = arith.constant 0 : index
    %c0_0 = arith.constant 0 : index
    %0 = vector.load %arg1[%c0, %c0_0] : memref<32x4xf32, #tpu.memory_space<vmem>>, vector<16x4xf32>
    %c16 = arith.constant 16 : index
    %c0_1 = arith.constant 0 : index
    %1 = vector.load %arg1[%c16, %c0_1] : memref<32x4xf32, #tpu.memory_space<vmem>>, vector<16x4xf32>
    %c0_2 = arith.constant 0 : index
    %c0_3 = arith.constant 0 : index
    %2 = vector.load %arg2[%c0_2, %c0_3] : memref<1080x64xf32, #tpu.memory_space<vmem>>, vector<16x16xf32>
    %c16_4 = arith.constant 16 : index
    %c0_5 = arith.constant 0 : index
    %3 = vector.load %arg2[%c16_4, %c0_5] : memref<1080x64xf32, #tpu.memory_space<vmem>>, vector<1x32xf32>
    %c24 = arith.constant 24 : index
    %c0_6 = arith.constant 0 : index
    %4 = vector.load %arg2[%c24, %c0_6] : memref<1080x64xf32, #tpu.memory_space<vmem>>, vector<1x32xf32>
    %c32 = arith.constant 32 : index
    %c0_7 = arith.constant 0 : index
    %5 = vector.load %arg2[%c32, %c0_7] : memref<1080x64xf32, #tpu.memory_space<vmem>>, vector<1x32xf32>
    %c40 = arith.constant 40 : index
    %c0_8 = arith.constant 0 : index
    %6 = vector.load %arg2[%c40, %c0_8] : memref<1080x64xf32, #tpu.memory_space<vmem>>, vector<1x32xf32>
    %c48 = arith.constant 48 : index
    %c0_9 = arith.constant 0 : index
    %7 = vector.load %arg2[%c48, %c0_9] : memref<1080x64xf32, #tpu.memory_space<vmem>>, vector<16x1xf32>
    %c64 = arith.constant 64 : index
    %c0_10 = arith.constant 0 : index
    %8 = vector.load %arg2[%c64, %c0_10] : memref<1080x64xf32, #tpu.memory_space<vmem>>, vector<16x1xf32>
    %cst = arith.constant 0.000000e+00 : f32
    %9 = vector.broadcast %cst : f32 to vector<16x4xf32>
    %cst_11 = arith.constant 0.000000e+00 : f32
    %10 = vector.broadcast %cst_11 : f32 to vector<16x4xf32>
    %cst_12 = arith.constant 0.000000e+00 : f32
    %11 = vector.broadcast %cst_12 : f32 to vector<16x4xf32>
    %cst_13 = arith.constant 0.000000e+00 : f32
    %12 = vector.broadcast %cst_13 : f32 to vector<16x4xf32>
    %c80 = arith.constant 80 : index
    %c0_14 = arith.constant 0 : index
    %13 = vector.load %arg2[%c80, %c0_14] : memref<1080x64xf32, #tpu.memory_space<vmem>>, vector<16x4xf32>
    %c7_i32 = arith.constant 7 : i32
    %14 = tpu.dynamic_rotate %0 by %c7_i32 dim 0 : vector<16x4xf32>, i32 -> vector<16x4xf32>
    %15 = arith.mulf %14, %13 : vector<16x4xf32>
    %16 = arith.addf %9, %15 : vector<16x4xf32>
    %c96 = arith.constant 96 : index
    %c0_15 = arith.constant 0 : index
    %17 = vector.load %arg2[%c96, %c0_15] : memref<1080x64xf32, #tpu.memory_space<vmem>>, vector<16x4xf32>
    %c6_i32 = arith.constant 6 : i32
    %18 = tpu.dynamic_rotate %0 by %c6_i32 dim 0 : vector<16x4xf32>, i32 -> vector<16x4xf32>
    %19 = arith.mulf %18, %17 : vector<16x4xf32>
    %20 = arith.addf %10, %19 : vector<16x4xf32>
    %c112 = arith.constant 112 : index
    %c0_16 = arith.constant 0 : index
    %21 = vector.load %arg2[%c112, %c0_16] : memref<1080x64xf32, #tpu.memory_space<vmem>>, vector<16x4xf32>
    %c5_i32 = arith.constant 5 : i32
    %22 = tpu.dynamic_rotate %0 by %c5_i32 dim 0 : vector<16x4xf32>, i32 -> vector<16x4xf32>
    %23 = arith.mulf %22, %21 : vector<16x4xf32>
    %24 = arith.addf %11, %23 : vector<16x4xf32>
    %c128 = arith.constant 128 : index
    %c0_17 = arith.constant 0 : index
    %25 = vector.load %arg2[%c128, %c0_17] : memref<1080x64xf32, #tpu.memory_space<vmem>>, vector<16x4xf32>
    %c4_i32 = arith.constant 4 : i32
    %26 = tpu.dynamic_rotate %0 by %c4_i32 dim 0 : vector<16x4xf32>, i32 -> vector<16x4xf32>
    %27 = arith.mulf %26, %25 : vector<16x4xf32>
    %28 = arith.addf %12, %27 : vector<16x4xf32>
    %c144 = arith.constant 144 : index
    %c0_18 = arith.constant 0 : index
    %29 = vector.load %arg2[%c144, %c0_18] : memref<1080x64xf32, #tpu.memory_space<vmem>>, vector<16x4xf32>
    %c3_i32 = arith.constant 3 : i32
    %30 = tpu.dynamic_rotate %0 by %c3_i32 dim 0 : vector<16x4xf32>, i32 -> vector<16x4xf32>
    %31 = arith.mulf %30, %29 : vector<16x4xf32>
    %32 = arith.addf %16, %31 : vector<16x4xf32>
    %c160 = arith.constant 160 : index
    %c0_19 = arith.constant 0 : index
    %33 = vector.load %arg2[%c160, %c0_19] : memref<1080x64xf32, #tpu.memory_space<vmem>>, vector<16x4xf32>
    %c2_i32 = arith.constant 2 : i32
    %34 = tpu.dynamic_rotate %0 by %c2_i32 dim 0 : vector<16x4xf32>, i32 -> vector<16x4xf32>
    %35 = arith.mulf %34, %33 : vector<16x4xf32>
    %36 = arith.addf %20, %35 : vector<16x4xf32>
    %c176 = arith.constant 176 : index
    %c0_20 = arith.constant 0 : index
    %37 = vector.load %arg2[%c176, %c0_20] : memref<1080x64xf32, #tpu.memory_space<vmem>>, vector<16x4xf32>
    %c1_i32 = arith.constant 1 : i32
    %38 = tpu.dynamic_rotate %0 by %c1_i32 dim 0 : vector<16x4xf32>, i32 -> vector<16x4xf32>
    %39 = arith.mulf %38, %37 : vector<16x4xf32>
    %40 = arith.addf %24, %39 : vector<16x4xf32>
    %c192 = arith.constant 192 : index
    %c0_21 = arith.constant 0 : index
    %41 = vector.load %arg2[%c192, %c0_21] : memref<1080x64xf32, #tpu.memory_space<vmem>>, vector<16x4xf32>
    %42 = arith.mulf %0, %41 : vector<16x4xf32>
    %43 = arith.addf %28, %42 : vector<16x4xf32>
    %c208 = arith.constant 208 : index
    %c0_22 = arith.constant 0 : index
    %44 = vector.load %arg2[%c208, %c0_22] : memref<1080x64xf32, #tpu.memory_space<vmem>>, vector<16x4xf32>
    %c15_i32 = arith.constant 15 : i32
    %45 = tpu.dynamic_rotate %0 by %c15_i32 dim 0 : vector<16x4xf32>, i32 -> vector<16x4xf32>
    %46 = arith.mulf %45, %44 : vector<16x4xf32>
    %47 = arith.addf %32, %46 : vector<16x4xf32>
    %c224 = arith.constant 224 : index
    %c0_23 = arith.constant 0 : index
    %48 = vector.load %arg2[%c224, %c0_23] : memref<1080x64xf32, #tpu.memory_space<vmem>>, vector<16x4xf32>
    %c14_i32 = arith.constant 14 : i32
    %49 = tpu.dynamic_rotate %0 by %c14_i32 dim 0 : vector<16x4xf32>, i32 -> vector<16x4xf32>
    %50 = arith.mulf %49, %48 : vector<16x4xf32>
    %51 = arith.addf %36, %50 : vector<16x4xf32>
    %c240 = arith.constant 240 : index
    %c0_24 = arith.constant 0 : index
    %52 = vector.load %arg2[%c240, %c0_24] : memref<1080x64xf32, #tpu.memory_space<vmem>>, vector<16x4xf32>
    %c13_i32 = arith.constant 13 : i32
    %53 = tpu.dynamic_rotate %0 by %c13_i32 dim 0 : vector<16x4xf32>, i32 -> vector<16x4xf32>
    %54 = arith.mulf %53, %52 : vector<16x4xf32>
    %55 = arith.addf %40, %54 : vector<16x4xf32>
    %c256 = arith.constant 256 : index
    %c0_25 = arith.constant 0 : index
    %56 = vector.load %arg2[%c256, %c0_25] : memref<1080x64xf32, #tpu.memory_space<vmem>>, vector<16x4xf32>
    %c12_i32 = arith.constant 12 : i32
    %57 = tpu.dynamic_rotate %0 by %c12_i32 dim 0 : vector<16x4xf32>, i32 -> vector<16x4xf32>
    %58 = arith.mulf %57, %56 : vector<16x4xf32>
    %59 = arith.addf %43, %58 : vector<16x4xf32>
    %c272 = arith.constant 272 : index
    %c0_26 = arith.constant 0 : index
    %60 = vector.load %arg2[%c272, %c0_26] : memref<1080x64xf32, #tpu.memory_space<vmem>>, vector<16x4xf32>
    %c11_i32 = arith.constant 11 : i32
    %61 = tpu.dynamic_rotate %0 by %c11_i32 dim 0 : vector<16x4xf32>, i32 -> vector<16x4xf32>
    %62 = arith.mulf %61, %60 : vector<16x4xf32>
    %63 = arith.addf %47, %62 : vector<16x4xf32>
    %c288 = arith.constant 288 : index
    %c0_27 = arith.constant 0 : index
    %64 = vector.load %arg2[%c288, %c0_27] : memref<1080x64xf32, #tpu.memory_space<vmem>>, vector<16x4xf32>
    %c10_i32 = arith.constant 10 : i32
    %65 = tpu.dynamic_rotate %0 by %c10_i32 dim 0 : vector<16x4xf32>, i32 -> vector<16x4xf32>
    %66 = arith.mulf %65, %64 : vector<16x4xf32>
    %67 = arith.addf %51, %66 : vector<16x4xf32>
    %c304 = arith.constant 304 : index
    %c0_28 = arith.constant 0 : index
    %68 = vector.load %arg2[%c304, %c0_28] : memref<1080x64xf32, #tpu.memory_space<vmem>>, vector<16x4xf32>
    %c9_i32 = arith.constant 9 : i32
    %69 = tpu.dynamic_rotate %0 by %c9_i32 dim 0 : vector<16x4xf32>, i32 -> vector<16x4xf32>
    %70 = arith.mulf %69, %68 : vector<16x4xf32>
    %71 = arith.addf %55, %70 : vector<16x4xf32>
    %72 = arith.addf %63, %67 : vector<16x4xf32>
    %73 = arith.addf %71, %59 : vector<16x4xf32>
    %74 = arith.addf %72, %73 : vector<16x4xf32>
    %c320 = arith.constant 320 : index
    %c0_29 = arith.constant 0 : index
    %75 = vector.load %arg2[%c320, %c0_29] : memref<1080x64xf32, #tpu.memory_space<vmem>>, vector<1x4xf32>
    %76 = vector.broadcast %75 : vector<1x4xf32> to vector<16x4xf32>
    %77 = arith.addf %74, %76 : vector<16x4xf32>
    %78 = arith.subf %0, %77 : vector<16x4xf32>
    %c1_i32_30 = arith.constant 1 : i32
    %79 = tpu.dynamic_rotate %78 by %c1_i32_30 dim 0 : vector<16x4xf32>, i32 -> vector<16x4xf32>
    %80 = vector.broadcast %7 : vector<16x1xf32> to vector<16x4xf32>
    %81 = arith.mulf %80, %79 : vector<16x4xf32>
    %cst_31 = arith.constant 1.000000e+00 : f32
    %82 = vector.broadcast %cst_31 : f32 to vector<16x1xf32>
    %83 = arith.subf %82, %7 : vector<16x1xf32>
    %c9_i32_32 = arith.constant 9 : i32
    %84 = tpu.dynamic_rotate %78 by %c9_i32_32 dim 0 : vector<16x4xf32>, i32 -> vector<16x4xf32>
    %85 = vector.broadcast %83 : vector<16x1xf32> to vector<16x4xf32>
    %86 = arith.mulf %85, %84 : vector<16x4xf32>
    %87 = arith.addf %81, %86 : vector<16x4xf32>
    %c15_i32_33 = arith.constant 15 : i32
    %88 = tpu.dynamic_rotate %78 by %c15_i32_33 dim 0 : vector<16x4xf32>, i32 -> vector<16x4xf32>
    %89 = vector.broadcast %8 : vector<16x1xf32> to vector<16x4xf32>
    %90 = arith.mulf %89, %88 : vector<16x4xf32>
    %cst_34 = arith.constant 1.000000e+00 : f32
    %91 = vector.broadcast %cst_34 : f32 to vector<16x1xf32>
    %92 = arith.subf %91, %8 : vector<16x1xf32>
    %c7_i32_35 = arith.constant 7 : i32
    %93 = tpu.dynamic_rotate %78 by %c7_i32_35 dim 0 : vector<16x4xf32>, i32 -> vector<16x4xf32>
    %94 = vector.broadcast %92 : vector<16x1xf32> to vector<16x4xf32>
    %95 = arith.mulf %94, %93 : vector<16x4xf32>
    %96 = arith.addf %90, %95 : vector<16x4xf32>
    %c328 = arith.constant 328 : index
    %c0_36 = arith.constant 0 : index
    %97 = vector.load %arg2[%c328, %c0_36] : memref<1080x64xf32, #tpu.memory_space<vmem>>, vector<4x32xf32>
    %cst_37 = arith.constant dense<0.000000e+00> : vector<16x32xf32>
    %98 = tpu.matmul %87, %97, %cst_37 {dimension_numbers = #tpu.dot_dimension_numbers<[1], [0], [0], [1], [0, 0, 1, 1], [], []>} : vector<16x4xf32>, vector<4x32xf32>, vector<16x32xf32> -> vector<16x32xf32>
    %c336 = arith.constant 336 : index
    %c0_38 = arith.constant 0 : index
    %99 = vector.load %arg2[%c336, %c0_38] : memref<1080x64xf32, #tpu.memory_space<vmem>>, vector<4x32xf32>
    %cst_39 = arith.constant dense<0.000000e+00> : vector<16x32xf32>
    %100 = tpu.matmul %78, %99, %cst_39 {dimension_numbers = #tpu.dot_dimension_numbers<[1], [0], [0], [1], [0, 0, 1, 1], [], []>} : vector<16x4xf32>, vector<4x32xf32>, vector<16x32xf32> -> vector<16x32xf32>
    %101 = arith.addf %98, %100 : vector<16x32xf32>
    %c344 = arith.constant 344 : index
    %c0_40 = arith.constant 0 : index
    %102 = vector.load %arg2[%c344, %c0_40] : memref<1080x64xf32, #tpu.memory_space<vmem>>, vector<4x32xf32>
    %cst_41 = arith.constant dense<0.000000e+00> : vector<16x32xf32>
    %103 = tpu.matmul %96, %102, %cst_41 {dimension_numbers = #tpu.dot_dimension_numbers<[1], [0], [0], [1], [0, 0, 1, 1], [], []>} : vector<16x4xf32>, vector<4x32xf32>, vector<16x32xf32> -> vector<16x32xf32>
    %104 = arith.addf %101, %103 : vector<16x32xf32>
    %c352 = arith.constant 352 : index
    %c0_42 = arith.constant 0 : index
    %105 = vector.load %arg2[%c352, %c0_42] : memref<1080x64xf32, #tpu.memory_space<vmem>>, vector<4x32xf32>
    %cst_43 = arith.constant dense<0.000000e+00> : vector<16x32xf32>
    %106 = tpu.matmul %1, %105, %cst_43 {dimension_numbers = #tpu.dot_dimension_numbers<[1], [0], [0], [1], [0, 0, 1, 1], [], []>} : vector<16x4xf32>, vector<4x32xf32>, vector<16x32xf32> -> vector<16x32xf32>
    %107 = arith.addf %104, %106 : vector<16x32xf32>
    %c376 = arith.constant 376 : index
    %c0_44 = arith.constant 0 : index
    %108 = vector.load %arg2[%c376, %c0_44] : memref<1080x64xf32, #tpu.memory_space<vmem>>, vector<1x32xf32>
    %c384 = arith.constant 384 : index
    %c0_45 = arith.constant 0 : index
    %109 = vector.load %arg2[%c384, %c0_45] : memref<1080x64xf32, #tpu.memory_space<vmem>>, vector<1x32xf32>
    %cst_46 = arith.constant dense<0.000000e+00> : vector<16xf32>
    %110 = vector.multi_reduction <add>, %107, %cst_46 [1] : vector<16x32xf32> to vector<16xf32>
    %111 = vector.shape_cast %110 : vector<16xf32> to vector<16x1xf32>
    %cst_47 = arith.constant 3.200000e+01 : f32
    %112 = vector.broadcast %cst_47 : f32 to vector<16x1xf32>
    %113 = arith.divf %111, %112 : vector<16x1xf32>
    %114 = vector.broadcast %113 : vector<16x1xf32> to vector<16x32xf32>
    %115 = arith.subf %107, %114 : vector<16x32xf32>
    %116 = arith.mulf %115, %115 : vector<16x32xf32>
    %cst_48 = arith.constant dense<0.000000e+00> : vector<16xf32>
    %117 = vector.multi_reduction <add>, %116, %cst_48 [1] : vector<16x32xf32> to vector<16xf32>
    %118 = vector.shape_cast %117 : vector<16xf32> to vector<16x1xf32>
    %cst_49 = arith.constant 3.200000e+01 : f32
    %119 = vector.broadcast %cst_49 : f32 to vector<16x1xf32>
    %120 = arith.divf %118, %119 : vector<16x1xf32>
    %121 = vector.broadcast %113 : vector<16x1xf32> to vector<16x32xf32>
    %122 = arith.subf %107, %121 : vector<16x32xf32>
    %cst_50 = arith.constant 9.99999974E-6 : f32
    %123 = vector.broadcast %cst_50 : f32 to vector<16x1xf32>
    %124 = arith.addf %120, %123 : vector<16x1xf32>
    %125 = math.rsqrt %124 : vector<16x1xf32>
    %126 = vector.broadcast %125 : vector<16x1xf32> to vector<16x32xf32>
    %127 = arith.mulf %122, %126 : vector<16x32xf32>
    %128 = vector.broadcast %108 : vector<1x32xf32> to vector<16x32xf32>
    %129 = arith.mulf %127, %128 : vector<16x32xf32>
    %130 = vector.broadcast %109 : vector<1x32xf32> to vector<16x32xf32>
    %131 = arith.addf %129, %130 : vector<16x32xf32>
    %c360 = arith.constant 360 : index
    %c0_51 = arith.constant 0 : index
    %132 = vector.load %arg2[%c360, %c0_51] : memref<1080x64xf32, #tpu.memory_space<vmem>>, vector<16x32xf32>
    %133 = arith.addf %131, %132 : vector<16x32xf32>
    %c392 = arith.constant 392 : index
    %c0_52 = arith.constant 0 : index
    %134 = vector.load %arg2[%c392, %c0_52] : memref<1080x64xf32, #tpu.memory_space<vmem>>, vector<32x32xf32>
    %cst_53 = arith.constant dense<0.000000e+00> : vector<16x32xf32>
    %135 = tpu.matmul %133, %134, %cst_53 {dimension_numbers = #tpu.dot_dimension_numbers<[1], [0], [0], [1], [0, 0, 1, 1], [], []>} : vector<16x32xf32>, vector<32x32xf32>, vector<16x32xf32> -> vector<16x32xf32>
    %c424 = arith.constant 424 : index
    %c0_54 = arith.constant 0 : index
    %136 = vector.load %arg2[%c424, %c0_54] : memref<1080x64xf32, #tpu.memory_space<vmem>>, vector<1x32xf32>
    %137 = vector.broadcast %136 : vector<1x32xf32> to vector<16x32xf32>
    %138 = arith.addf %135, %137 : vector<16x32xf32>
    %c432 = arith.constant 432 : index
    %c0_55 = arith.constant 0 : index
    %139 = vector.load %arg2[%c432, %c0_55] : memref<1080x64xf32, #tpu.memory_space<vmem>>, vector<32x32xf32>
    %cst_56 = arith.constant dense<0.000000e+00> : vector<16x32xf32>
    %140 = tpu.matmul %133, %139, %cst_56 {dimension_numbers = #tpu.dot_dimension_numbers<[1], [0], [0], [1], [0, 0, 1, 1], [], []>} : vector<16x32xf32>, vector<32x32xf32>, vector<16x32xf32> -> vector<16x32xf32>
    %c464 = arith.constant 464 : index
    %c0_57 = arith.constant 0 : index
    %141 = vector.load %arg2[%c464, %c0_57] : memref<1080x64xf32, #tpu.memory_space<vmem>>, vector<1x32xf32>
    %142 = vector.broadcast %141 : vector<1x32xf32> to vector<16x32xf32>
    %143 = arith.addf %140, %142 : vector<16x32xf32>
    %c472 = arith.constant 472 : index
    %c0_58 = arith.constant 0 : index
    %144 = vector.load %arg2[%c472, %c0_58] : memref<1080x64xf32, #tpu.memory_space<vmem>>, vector<32x32xf32>
    %cst_59 = arith.constant dense<0.000000e+00> : vector<16x32xf32>
    %145 = tpu.matmul %133, %144, %cst_59 {dimension_numbers = #tpu.dot_dimension_numbers<[1], [0], [0], [1], [0, 0, 1, 1], [], []>} : vector<16x32xf32>, vector<32x32xf32>, vector<16x32xf32> -> vector<16x32xf32>
    %c504 = arith.constant 504 : index
    %c0_60 = arith.constant 0 : index
    %146 = vector.load %arg2[%c504, %c0_60] : memref<1080x64xf32, #tpu.memory_space<vmem>>, vector<1x32xf32>
    %147 = vector.broadcast %146 : vector<1x32xf32> to vector<16x32xf32>
    %148 = arith.addf %145, %147 : vector<16x32xf32>
    %cst_61 = arith.constant 0.000000e+00 : f32
    %149 = vector.broadcast %cst_61 : f32 to vector<16x32xf32>
    %150 = vector.broadcast %3 : vector<1x32xf32> to vector<16x32xf32>
    %151 = arith.mulf %138, %150 : vector<16x32xf32>
    %cst_62 = arith.constant dense<0.000000e+00> : vector<16x16xf32>
    %152 = tpu.matmul %151, %143, %cst_62 {dimension_numbers = #tpu.dot_dimension_numbers<[1], [1], [0], [0], [0, 0, 1, 0], [], []>} : vector<16x32xf32>, vector<16x32xf32>, vector<16x16xf32> -> vector<16x16xf32>
    %153 = arith.addf %152, %2 : vector<16x16xf32>
    %cst_63 = arith.constant dense<0xFF800000> : vector<16xf32>
    %154 = vector.multi_reduction <maximumf>, %153, %cst_63 [1] : vector<16x16xf32> to vector<16xf32>
    %155 = vector.shape_cast %154 : vector<16xf32> to vector<16x1xf32>
    %156 = vector.broadcast %155 : vector<16x1xf32> to vector<16x16xf32>
    %157 = arith.subf %153, %156 : vector<16x16xf32>
    %158 = math.exp %157 : vector<16x16xf32>
    %cst_64 = arith.constant dense<0.000000e+00> : vector<16xf32>
    %159 = vector.multi_reduction <add>, %158, %cst_64 [1] : vector<16x16xf32> to vector<16xf32>
    %160 = vector.shape_cast %159 : vector<16xf32> to vector<16x1xf32>
    %161 = tpu.reciprocal %160 {approx = true} : vector<16x1xf32> -> vector<16x1xf32>
    %162 = vector.broadcast %161 : vector<16x1xf32> to vector<16x16xf32>
    %163 = arith.mulf %158, %162 : vector<16x16xf32>
    %164 = vector.broadcast %3 : vector<1x32xf32> to vector<16x32xf32>
    %165 = arith.mulf %148, %164 : vector<16x32xf32>
    %cst_65 = arith.constant dense<0.000000e+00> : vector<16x32xf32>
    %166 = tpu.matmul %163, %165, %cst_65 {dimension_numbers = #tpu.dot_dimension_numbers<[1], [0], [0], [1], [0, 0, 1, 1], [], []>} : vector<16x16xf32>, vector<16x32xf32>, vector<16x32xf32> -> vector<16x32xf32>
    %167 = arith.addf %149, %166 : vector<16x32xf32>
    %168 = vector.broadcast %4 : vector<1x32xf32> to vector<16x32xf32>
    %169 = arith.mulf %138, %168 : vector<16x32xf32>
    %cst_66 = arith.constant dense<0.000000e+00> : vector<16x16xf32>
    %170 = tpu.matmul %169, %143, %cst_66 {dimension_numbers = #tpu.dot_dimension_numbers<[1], [1], [0], [0], [0, 0, 1, 0], [], []>} : vector<16x32xf32>, vector<16x32xf32>, vector<16x16xf32> -> vector<16x16xf32>
    %171 = arith.addf %170, %2 : vector<16x16xf32>
    %cst_67 = arith.constant dense<0xFF800000> : vector<16xf32>
    %172 = vector.multi_reduction <maximumf>, %171, %cst_67 [1] : vector<16x16xf32> to vector<16xf32>
    %173 = vector.shape_cast %172 : vector<16xf32> to vector<16x1xf32>
    %174 = vector.broadcast %173 : vector<16x1xf32> to vector<16x16xf32>
    %175 = arith.subf %171, %174 : vector<16x16xf32>
    %176 = math.exp %175 : vector<16x16xf32>
    %cst_68 = arith.constant dense<0.000000e+00> : vector<16xf32>
    %177 = vector.multi_reduction <add>, %176, %cst_68 [1] : vector<16x16xf32> to vector<16xf32>
    %178 = vector.shape_cast %177 : vector<16xf32> to vector<16x1xf32>
    %179 = tpu.reciprocal %178 {approx = true} : vector<16x1xf32> -> vector<16x1xf32>
    %180 = vector.broadcast %179 : vector<16x1xf32> to vector<16x16xf32>
    %181 = arith.mulf %176, %180 : vector<16x16xf32>
    %182 = vector.broadcast %4 : vector<1x32xf32> to vector<16x32xf32>
    %183 = arith.mulf %148, %182 : vector<16x32xf32>
    %cst_69 = arith.constant dense<0.000000e+00> : vector<16x32xf32>
    %184 = tpu.matmul %181, %183, %cst_69 {dimension_numbers = #tpu.dot_dimension_numbers<[1], [0], [0], [1], [0, 0, 1, 1], [], []>} : vector<16x16xf32>, vector<16x32xf32>, vector<16x32xf32> -> vector<16x32xf32>
    %185 = arith.addf %167, %184 : vector<16x32xf32>
    %186 = vector.broadcast %5 : vector<1x32xf32> to vector<16x32xf32>
    %187 = arith.mulf %138, %186 : vector<16x32xf32>
    %cst_70 = arith.constant dense<0.000000e+00> : vector<16x16xf32>
    %188 = tpu.matmul %187, %143, %cst_70 {dimension_numbers = #tpu.dot_dimension_numbers<[1], [1], [0], [0], [0, 0, 1, 0], [], []>} : vector<16x32xf32>, vector<16x32xf32>, vector<16x16xf32> -> vector<16x16xf32>
    %189 = arith.addf %188, %2 : vector<16x16xf32>
    %cst_71 = arith.constant dense<0xFF800000> : vector<16xf32>
    %190 = vector.multi_reduction <maximumf>, %189, %cst_71 [1] : vector<16x16xf32> to vector<16xf32>
    %191 = vector.shape_cast %190 : vector<16xf32> to vector<16x1xf32>
    %192 = vector.broadcast %191 : vector<16x1xf32> to vector<16x16xf32>
    %193 = arith.subf %189, %192 : vector<16x16xf32>
    %194 = math.exp %193 : vector<16x16xf32>
    %cst_72 = arith.constant dense<0.000000e+00> : vector<16xf32>
    %195 = vector.multi_reduction <add>, %194, %cst_72 [1] : vector<16x16xf32> to vector<16xf32>
    %196 = vector.shape_cast %195 : vector<16xf32> to vector<16x1xf32>
    %197 = tpu.reciprocal %196 {approx = true} : vector<16x1xf32> -> vector<16x1xf32>
    %198 = vector.broadcast %197 : vector<16x1xf32> to vector<16x16xf32>
    %199 = arith.mulf %194, %198 : vector<16x16xf32>
    %200 = vector.broadcast %5 : vector<1x32xf32> to vector<16x32xf32>
    %201 = arith.mulf %148, %200 : vector<16x32xf32>
    %cst_73 = arith.constant dense<0.000000e+00> : vector<16x32xf32>
    %202 = tpu.matmul %199, %201, %cst_73 {dimension_numbers = #tpu.dot_dimension_numbers<[1], [0], [0], [1], [0, 0, 1, 1], [], []>} : vector<16x16xf32>, vector<16x32xf32>, vector<16x32xf32> -> vector<16x32xf32>
    %203 = arith.addf %185, %202 : vector<16x32xf32>
    %204 = vector.broadcast %6 : vector<1x32xf32> to vector<16x32xf32>
    %205 = arith.mulf %138, %204 : vector<16x32xf32>
    %cst_74 = arith.constant dense<0.000000e+00> : vector<16x16xf32>
    %206 = tpu.matmul %205, %143, %cst_74 {dimension_numbers = #tpu.dot_dimension_numbers<[1], [1], [0], [0], [0, 0, 1, 0], [], []>} : vector<16x32xf32>, vector<16x32xf32>, vector<16x16xf32> -> vector<16x16xf32>
    %207 = arith.addf %206, %2 : vector<16x16xf32>
    %cst_75 = arith.constant dense<0xFF800000> : vector<16xf32>
    %208 = vector.multi_reduction <maximumf>, %207, %cst_75 [1] : vector<16x16xf32> to vector<16xf32>
    %209 = vector.shape_cast %208 : vector<16xf32> to vector<16x1xf32>
    %210 = vector.broadcast %209 : vector<16x1xf32> to vector<16x16xf32>
    %211 = arith.subf %207, %210 : vector<16x16xf32>
    %212 = math.exp %211 : vector<16x16xf32>
    %cst_76 = arith.constant dense<0.000000e+00> : vector<16xf32>
    %213 = vector.multi_reduction <add>, %212, %cst_76 [1] : vector<16x16xf32> to vector<16xf32>
    %214 = vector.shape_cast %213 : vector<16xf32> to vector<16x1xf32>
    %215 = tpu.reciprocal %214 {approx = true} : vector<16x1xf32> -> vector<16x1xf32>
    %216 = vector.broadcast %215 : vector<16x1xf32> to vector<16x16xf32>
    %217 = arith.mulf %212, %216 : vector<16x16xf32>
    %218 = vector.broadcast %6 : vector<1x32xf32> to vector<16x32xf32>
    %219 = arith.mulf %148, %218 : vector<16x32xf32>
    %cst_77 = arith.constant dense<0.000000e+00> : vector<16x32xf32>
    %220 = tpu.matmul %217, %219, %cst_77 {dimension_numbers = #tpu.dot_dimension_numbers<[1], [0], [0], [1], [0, 0, 1, 1], [], []>} : vector<16x16xf32>, vector<16x32xf32>, vector<16x32xf32> -> vector<16x32xf32>
    %221 = arith.addf %203, %220 : vector<16x32xf32>
    %c512 = arith.constant 512 : index
    %c0_78 = arith.constant 0 : index
    %222 = vector.load %arg2[%c512, %c0_78] : memref<1080x64xf32, #tpu.memory_space<vmem>>, vector<32x32xf32>
    %cst_79 = arith.constant dense<0.000000e+00> : vector<16x32xf32>
    %223 = tpu.matmul %221, %222, %cst_79 {dimension_numbers = #tpu.dot_dimension_numbers<[1], [0], [0], [1], [0, 0, 1, 1], [], []>} : vector<16x32xf32>, vector<32x32xf32>, vector<16x32xf32> -> vector<16x32xf32>
    %c544 = arith.constant 544 : index
    %c0_80 = arith.constant 0 : index
    %224 = vector.load %arg2[%c544, %c0_80] : memref<1080x64xf32, #tpu.memory_space<vmem>>, vector<1x32xf32>
    %225 = vector.broadcast %224 : vector<1x32xf32> to vector<16x32xf32>
    %226 = arith.addf %223, %225 : vector<16x32xf32>
    %c552 = arith.constant 552 : index
    %c0_81 = arith.constant 0 : index
    %227 = vector.load %arg2[%c552, %c0_81] : memref<1080x64xf32, #tpu.memory_space<vmem>>, vector<32x32xf32>
    %cst_82 = arith.constant dense<0.000000e+00> : vector<16x32xf32>
    %228 = tpu.matmul %226, %227, %cst_82 {dimension_numbers = #tpu.dot_dimension_numbers<[1], [0], [0], [1], [0, 0, 1, 1], [], []>} : vector<16x32xf32>, vector<32x32xf32>, vector<16x32xf32> -> vector<16x32xf32>
    %c584 = arith.constant 584 : index
    %c0_83 = arith.constant 0 : index
    %229 = vector.load %arg2[%c584, %c0_83] : memref<1080x64xf32, #tpu.memory_space<vmem>>, vector<32x32xf32>
    %cst_84 = arith.constant dense<0.000000e+00> : vector<16x32xf32>
    %230 = tpu.matmul %107, %229, %cst_84 {dimension_numbers = #tpu.dot_dimension_numbers<[1], [0], [0], [1], [0, 0, 1, 1], [], []>} : vector<16x32xf32>, vector<32x32xf32>, vector<16x32xf32> -> vector<16x32xf32>
    %231 = arith.addf %228, %230 : vector<16x32xf32>
    %c616 = arith.constant 616 : index
    %c0_85 = arith.constant 0 : index
    %232 = vector.load %arg2[%c616, %c0_85] : memref<1080x64xf32, #tpu.memory_space<vmem>>, vector<1x32xf32>
    %233 = vector.broadcast %232 : vector<1x32xf32> to vector<16x32xf32>
    %234 = arith.addf %231, %233 : vector<16x32xf32>
    %235 = arith.negf %234 : vector<16x32xf32>
    %236 = math.exp %235 : vector<16x32xf32>
    %cst_86 = arith.constant 1.000000e+00 : f32
    %237 = vector.broadcast %cst_86 : f32 to vector<16x32xf32>
    %238 = arith.addf %237, %236 : vector<16x32xf32>
    %239 = arith.divf %237, %238 : vector<16x32xf32>
    %240 = arith.mulf %239, %226 : vector<16x32xf32>
    %cst_87 = arith.constant 1.000000e+00 : f32
    %241 = vector.broadcast %cst_87 : f32 to vector<16x32xf32>
    %242 = arith.subf %241, %239 : vector<16x32xf32>
    %243 = arith.mulf %242, %107 : vector<16x32xf32>
    %244 = arith.addf %240, %243 : vector<16x32xf32>
    %cst_88 = arith.constant 0.000000e+00 : f32
    %245 = vector.broadcast %cst_88 : f32 to vector<16x32xf32>
    %cst_89 = arith.constant 0.000000e+00 : f32
    %246 = vector.broadcast %cst_89 : f32 to vector<16x32xf32>
    %cst_90 = arith.constant 0.000000e+00 : f32
    %247 = vector.broadcast %cst_90 : f32 to vector<16x32xf32>
    %cst_91 = arith.constant 0.000000e+00 : f32
    %248 = vector.broadcast %cst_91 : f32 to vector<16x32xf32>
    %c624 = arith.constant 624 : index
    %c0_92 = arith.constant 0 : index
    %249 = vector.load %arg2[%c624, %c0_92] : memref<1080x64xf32, #tpu.memory_space<vmem>>, vector<16x32xf32>
    %c7_i32_93 = arith.constant 7 : i32
    %250 = tpu.dynamic_rotate %244 by %c7_i32_93 dim 0 : vector<16x32xf32>, i32 -> vector<16x32xf32>
    %251 = arith.mulf %250, %249 : vector<16x32xf32>
    %252 = arith.addf %245, %251 : vector<16x32xf32>
    %c640 = arith.constant 640 : index
    %c0_94 = arith.constant 0 : index
    %253 = vector.load %arg2[%c640, %c0_94] : memref<1080x64xf32, #tpu.memory_space<vmem>>, vector<16x32xf32>
    %c6_i32_95 = arith.constant 6 : i32
    %254 = tpu.dynamic_rotate %244 by %c6_i32_95 dim 0 : vector<16x32xf32>, i32 -> vector<16x32xf32>
    %255 = arith.mulf %254, %253 : vector<16x32xf32>
    %256 = arith.addf %246, %255 : vector<16x32xf32>
    %c656 = arith.constant 656 : index
    %c0_96 = arith.constant 0 : index
    %257 = vector.load %arg2[%c656, %c0_96] : memref<1080x64xf32, #tpu.memory_space<vmem>>, vector<16x32xf32>
    %c5_i32_97 = arith.constant 5 : i32
    %258 = tpu.dynamic_rotate %244 by %c5_i32_97 dim 0 : vector<16x32xf32>, i32 -> vector<16x32xf32>
    %259 = arith.mulf %258, %257 : vector<16x32xf32>
    %260 = arith.addf %247, %259 : vector<16x32xf32>
    %c672 = arith.constant 672 : index
    %c0_98 = arith.constant 0 : index
    %261 = vector.load %arg2[%c672, %c0_98] : memref<1080x64xf32, #tpu.memory_space<vmem>>, vector<16x32xf32>
    %c4_i32_99 = arith.constant 4 : i32
    %262 = tpu.dynamic_rotate %244 by %c4_i32_99 dim 0 : vector<16x32xf32>, i32 -> vector<16x32xf32>
    %263 = arith.mulf %262, %261 : vector<16x32xf32>
    %264 = arith.addf %248, %263 : vector<16x32xf32>
    %c688 = arith.constant 688 : index
    %c0_100 = arith.constant 0 : index
    %265 = vector.load %arg2[%c688, %c0_100] : memref<1080x64xf32, #tpu.memory_space<vmem>>, vector<16x32xf32>
    %c3_i32_101 = arith.constant 3 : i32
    %266 = tpu.dynamic_rotate %244 by %c3_i32_101 dim 0 : vector<16x32xf32>, i32 -> vector<16x32xf32>
    %267 = arith.mulf %266, %265 : vector<16x32xf32>
    %268 = arith.addf %252, %267 : vector<16x32xf32>
    %c704 = arith.constant 704 : index
    %c0_102 = arith.constant 0 : index
    %269 = vector.load %arg2[%c704, %c0_102] : memref<1080x64xf32, #tpu.memory_space<vmem>>, vector<16x32xf32>
    %c2_i32_103 = arith.constant 2 : i32
    %270 = tpu.dynamic_rotate %244 by %c2_i32_103 dim 0 : vector<16x32xf32>, i32 -> vector<16x32xf32>
    %271 = arith.mulf %270, %269 : vector<16x32xf32>
    %272 = arith.addf %256, %271 : vector<16x32xf32>
    %c720 = arith.constant 720 : index
    %c0_104 = arith.constant 0 : index
    %273 = vector.load %arg2[%c720, %c0_104] : memref<1080x64xf32, #tpu.memory_space<vmem>>, vector<16x32xf32>
    %c1_i32_105 = arith.constant 1 : i32
    %274 = tpu.dynamic_rotate %244 by %c1_i32_105 dim 0 : vector<16x32xf32>, i32 -> vector<16x32xf32>
    %275 = arith.mulf %274, %273 : vector<16x32xf32>
    %276 = arith.addf %260, %275 : vector<16x32xf32>
    %c736 = arith.constant 736 : index
    %c0_106 = arith.constant 0 : index
    %277 = vector.load %arg2[%c736, %c0_106] : memref<1080x64xf32, #tpu.memory_space<vmem>>, vector<16x32xf32>
    %278 = arith.mulf %244, %277 : vector<16x32xf32>
    %279 = arith.addf %264, %278 : vector<16x32xf32>
    %c752 = arith.constant 752 : index
    %c0_107 = arith.constant 0 : index
    %280 = vector.load %arg2[%c752, %c0_107] : memref<1080x64xf32, #tpu.memory_space<vmem>>, vector<16x32xf32>
    %c15_i32_108 = arith.constant 15 : i32
    %281 = tpu.dynamic_rotate %244 by %c15_i32_108 dim 0 : vector<16x32xf32>, i32 -> vector<16x32xf32>
    %282 = arith.mulf %281, %280 : vector<16x32xf32>
    %283 = arith.addf %268, %282 : vector<16x32xf32>
    %c768 = arith.constant 768 : index
    %c0_109 = arith.constant 0 : index
    %284 = vector.load %arg2[%c768, %c0_109] : memref<1080x64xf32, #tpu.memory_space<vmem>>, vector<16x32xf32>
    %c14_i32_110 = arith.constant 14 : i32
    %285 = tpu.dynamic_rotate %244 by %c14_i32_110 dim 0 : vector<16x32xf32>, i32 -> vector<16x32xf32>
    %286 = arith.mulf %285, %284 : vector<16x32xf32>
    %287 = arith.addf %272, %286 : vector<16x32xf32>
    %c784 = arith.constant 784 : index
    %c0_111 = arith.constant 0 : index
    %288 = vector.load %arg2[%c784, %c0_111] : memref<1080x64xf32, #tpu.memory_space<vmem>>, vector<16x32xf32>
    %c13_i32_112 = arith.constant 13 : i32
    %289 = tpu.dynamic_rotate %244 by %c13_i32_112 dim 0 : vector<16x32xf32>, i32 -> vector<16x32xf32>
    %290 = arith.mulf %289, %288 : vector<16x32xf32>
    %291 = arith.addf %276, %290 : vector<16x32xf32>
    %c800 = arith.constant 800 : index
    %c0_113 = arith.constant 0 : index
    %292 = vector.load %arg2[%c800, %c0_113] : memref<1080x64xf32, #tpu.memory_space<vmem>>, vector<16x32xf32>
    %c12_i32_114 = arith.constant 12 : i32
    %293 = tpu.dynamic_rotate %244 by %c12_i32_114 dim 0 : vector<16x32xf32>, i32 -> vector<16x32xf32>
    %294 = arith.mulf %293, %292 : vector<16x32xf32>
    %295 = arith.addf %279, %294 : vector<16x32xf32>
    %c816 = arith.constant 816 : index
    %c0_115 = arith.constant 0 : index
    %296 = vector.load %arg2[%c816, %c0_115] : memref<1080x64xf32, #tpu.memory_space<vmem>>, vector<16x32xf32>
    %c11_i32_116 = arith.constant 11 : i32
    %297 = tpu.dynamic_rotate %244 by %c11_i32_116 dim 0 : vector<16x32xf32>, i32 -> vector<16x32xf32>
    %298 = arith.mulf %297, %296 : vector<16x32xf32>
    %299 = arith.addf %283, %298 : vector<16x32xf32>
    %c832 = arith.constant 832 : index
    %c0_117 = arith.constant 0 : index
    %300 = vector.load %arg2[%c832, %c0_117] : memref<1080x64xf32, #tpu.memory_space<vmem>>, vector<16x32xf32>
    %c10_i32_118 = arith.constant 10 : i32
    %301 = tpu.dynamic_rotate %244 by %c10_i32_118 dim 0 : vector<16x32xf32>, i32 -> vector<16x32xf32>
    %302 = arith.mulf %301, %300 : vector<16x32xf32>
    %303 = arith.addf %287, %302 : vector<16x32xf32>
    %c848 = arith.constant 848 : index
    %c0_119 = arith.constant 0 : index
    %304 = vector.load %arg2[%c848, %c0_119] : memref<1080x64xf32, #tpu.memory_space<vmem>>, vector<16x32xf32>
    %c9_i32_120 = arith.constant 9 : i32
    %305 = tpu.dynamic_rotate %244 by %c9_i32_120 dim 0 : vector<16x32xf32>, i32 -> vector<16x32xf32>
    %306 = arith.mulf %305, %304 : vector<16x32xf32>
    %307 = arith.addf %291, %306 : vector<16x32xf32>
    %308 = arith.addf %299, %303 : vector<16x32xf32>
    %309 = arith.addf %307, %295 : vector<16x32xf32>
    %310 = arith.addf %308, %309 : vector<16x32xf32>
    %c864 = arith.constant 864 : index
    %c0_121 = arith.constant 0 : index
    %311 = vector.load %arg2[%c864, %c0_121] : memref<1080x64xf32, #tpu.memory_space<vmem>>, vector<1x32xf32>
    %312 = vector.broadcast %311 : vector<1x32xf32> to vector<16x32xf32>
    %313 = arith.addf %310, %312 : vector<16x32xf32>
    %314 = arith.subf %244, %313 : vector<16x32xf32>
    %c872 = arith.constant 872 : index
    %c0_122 = arith.constant 0 : index
    %315 = vector.load %arg2[%c872, %c0_122] : memref<1080x64xf32, #tpu.memory_space<vmem>>, vector<1x32xf32>
    %c880 = arith.constant 880 : index
    %c0_123 = arith.constant 0 : index
    %316 = vector.load %arg2[%c880, %c0_123] : memref<1080x64xf32, #tpu.memory_space<vmem>>, vector<1x32xf32>
    %cst_124 = arith.constant dense<0.000000e+00> : vector<16xf32>
    %317 = vector.multi_reduction <add>, %314, %cst_124 [1] : vector<16x32xf32> to vector<16xf32>
    %318 = vector.shape_cast %317 : vector<16xf32> to vector<16x1xf32>
    %cst_125 = arith.constant 3.200000e+01 : f32
    %319 = vector.broadcast %cst_125 : f32 to vector<16x1xf32>
    %320 = arith.divf %318, %319 : vector<16x1xf32>
    %321 = vector.broadcast %320 : vector<16x1xf32> to vector<16x32xf32>
    %322 = arith.subf %314, %321 : vector<16x32xf32>
    %323 = arith.mulf %322, %322 : vector<16x32xf32>
    %cst_126 = arith.constant dense<0.000000e+00> : vector<16xf32>
    %324 = vector.multi_reduction <add>, %323, %cst_126 [1] : vector<16x32xf32> to vector<16xf32>
    %325 = vector.shape_cast %324 : vector<16xf32> to vector<16x1xf32>
    %cst_127 = arith.constant 3.200000e+01 : f32
    %326 = vector.broadcast %cst_127 : f32 to vector<16x1xf32>
    %327 = arith.divf %325, %326 : vector<16x1xf32>
    %328 = vector.broadcast %320 : vector<16x1xf32> to vector<16x32xf32>
    %329 = arith.subf %314, %328 : vector<16x32xf32>
    %cst_128 = arith.constant 9.99999974E-6 : f32
    %330 = vector.broadcast %cst_128 : f32 to vector<16x1xf32>
    %331 = arith.addf %327, %330 : vector<16x1xf32>
    %332 = math.rsqrt %331 : vector<16x1xf32>
    %333 = vector.broadcast %332 : vector<16x1xf32> to vector<16x32xf32>
    %334 = arith.mulf %329, %333 : vector<16x32xf32>
    %335 = vector.broadcast %315 : vector<1x32xf32> to vector<16x32xf32>
    %336 = arith.mulf %334, %335 : vector<16x32xf32>
    %337 = vector.broadcast %316 : vector<1x32xf32> to vector<16x32xf32>
    %338 = arith.addf %336, %337 : vector<16x32xf32>
    %c888 = arith.constant 888 : index
    %c0_129 = arith.constant 0 : index
    %339 = vector.load %arg2[%c888, %c0_129] : memref<1080x64xf32, #tpu.memory_space<vmem>>, vector<32x64xf32>
    %cst_130 = arith.constant dense<0.000000e+00> : vector<16x64xf32>
    %340 = tpu.matmul %338, %339, %cst_130 {dimension_numbers = #tpu.dot_dimension_numbers<[1], [0], [0], [1], [0, 0, 1, 1], [], []>} : vector<16x32xf32>, vector<32x64xf32>, vector<16x64xf32> -> vector<16x64xf32>
    %c920 = arith.constant 920 : index
    %c0_131 = arith.constant 0 : index
    %341 = vector.load %arg2[%c920, %c0_131] : memref<1080x64xf32, #tpu.memory_space<vmem>>, vector<1x64xf32>
    %342 = vector.broadcast %341 : vector<1x64xf32> to vector<16x64xf32>
    %343 = arith.addf %340, %342 : vector<16x64xf32>
    %c928 = arith.constant 928 : index
    %c0_132 = arith.constant 0 : index
    %344 = vector.load %arg2[%c928, %c0_132] : memref<1080x64xf32, #tpu.memory_space<vmem>>, vector<32x64xf32>
    %cst_133 = arith.constant dense<0.000000e+00> : vector<16x64xf32>
    %345 = tpu.matmul %338, %344, %cst_133 {dimension_numbers = #tpu.dot_dimension_numbers<[1], [0], [0], [1], [0, 0, 1, 1], [], []>} : vector<16x32xf32>, vector<32x64xf32>, vector<16x64xf32> -> vector<16x64xf32>
    %c960 = arith.constant 960 : index
    %c0_134 = arith.constant 0 : index
    %346 = vector.load %arg2[%c960, %c0_134] : memref<1080x64xf32, #tpu.memory_space<vmem>>, vector<1x64xf32>
    %347 = vector.broadcast %346 : vector<1x64xf32> to vector<16x64xf32>
    %348 = arith.addf %345, %347 : vector<16x64xf32>
    %349 = arith.negf %348 : vector<16x64xf32>
    %350 = math.exp %349 : vector<16x64xf32>
    %cst_135 = arith.constant 1.000000e+00 : f32
    %351 = vector.broadcast %cst_135 : f32 to vector<16x64xf32>
    %352 = arith.addf %351, %350 : vector<16x64xf32>
    %353 = arith.divf %351, %352 : vector<16x64xf32>
    %354 = arith.mulf %343, %353 : vector<16x64xf32>
    %c968 = arith.constant 968 : index
    %c0_136 = arith.constant 0 : index
    %355 = vector.load %arg2[%c968, %c0_136] : memref<1080x64xf32, #tpu.memory_space<vmem>>, vector<64x32xf32>
    %cst_137 = arith.constant dense<0.000000e+00> : vector<16x32xf32>
    %356 = tpu.matmul %354, %355, %cst_137 {dimension_numbers = #tpu.dot_dimension_numbers<[1], [0], [0], [1], [0, 0, 1, 1], [], []>} : vector<16x64xf32>, vector<64x32xf32>, vector<16x32xf32> -> vector<16x32xf32>
    %c1032 = arith.constant 1032 : index
    %c0_138 = arith.constant 0 : index
    %357 = vector.load %arg2[%c1032, %c0_138] : memref<1080x64xf32, #tpu.memory_space<vmem>>, vector<1x32xf32>
    %358 = vector.broadcast %357 : vector<1x32xf32> to vector<16x32xf32>
    %359 = arith.addf %356, %358 : vector<16x32xf32>
    %c552_139 = arith.constant 552 : index
    %c0_140 = arith.constant 0 : index
    %360 = vector.load %arg2[%c552_139, %c0_140] : memref<1080x64xf32, #tpu.memory_space<vmem>>, vector<32x32xf32>
    %cst_141 = arith.constant dense<0.000000e+00> : vector<16x32xf32>
    %361 = tpu.matmul %359, %360, %cst_141 {dimension_numbers = #tpu.dot_dimension_numbers<[1], [0], [0], [1], [0, 0, 1, 1], [], []>} : vector<16x32xf32>, vector<32x32xf32>, vector<16x32xf32> -> vector<16x32xf32>
    %c584_142 = arith.constant 584 : index
    %c0_143 = arith.constant 0 : index
    %362 = vector.load %arg2[%c584_142, %c0_143] : memref<1080x64xf32, #tpu.memory_space<vmem>>, vector<32x32xf32>
    %cst_144 = arith.constant dense<0.000000e+00> : vector<16x32xf32>
    %363 = tpu.matmul %314, %362, %cst_144 {dimension_numbers = #tpu.dot_dimension_numbers<[1], [0], [0], [1], [0, 0, 1, 1], [], []>} : vector<16x32xf32>, vector<32x32xf32>, vector<16x32xf32> -> vector<16x32xf32>
    %364 = arith.addf %361, %363 : vector<16x32xf32>
    %c616_145 = arith.constant 616 : index
    %c0_146 = arith.constant 0 : index
    %365 = vector.load %arg2[%c616_145, %c0_146] : memref<1080x64xf32, #tpu.memory_space<vmem>>, vector<1x32xf32>
    %366 = vector.broadcast %365 : vector<1x32xf32> to vector<16x32xf32>
    %367 = arith.addf %364, %366 : vector<16x32xf32>
    %368 = arith.negf %367 : vector<16x32xf32>
    %369 = math.exp %368 : vector<16x32xf32>
    %cst_147 = arith.constant 1.000000e+00 : f32
    %370 = vector.broadcast %cst_147 : f32 to vector<16x32xf32>
    %371 = arith.addf %370, %369 : vector<16x32xf32>
    %372 = arith.divf %370, %371 : vector<16x32xf32>
    %373 = arith.mulf %372, %359 : vector<16x32xf32>
    %cst_148 = arith.constant 1.000000e+00 : f32
    %374 = vector.broadcast %cst_148 : f32 to vector<16x32xf32>
    %375 = arith.subf %374, %372 : vector<16x32xf32>
    %376 = arith.mulf %375, %314 : vector<16x32xf32>
    %377 = arith.addf %373, %376 : vector<16x32xf32>
    %c1040 = arith.constant 1040 : index
    %c0_149 = arith.constant 0 : index
    %378 = vector.load %arg2[%c1040, %c0_149] : memref<1080x64xf32, #tpu.memory_space<vmem>>, vector<32x4xf32>
    %cst_150 = arith.constant dense<0.000000e+00> : vector<16x4xf32>
    %379 = tpu.matmul %377, %378, %cst_150 {dimension_numbers = #tpu.dot_dimension_numbers<[1], [0], [0], [1], [0, 0, 1, 1], [], []>} : vector<16x32xf32>, vector<32x4xf32>, vector<16x4xf32> -> vector<16x4xf32>
    %c1072 = arith.constant 1072 : index
    %c0_151 = arith.constant 0 : index
    %380 = vector.load %arg2[%c1072, %c0_151] : memref<1080x64xf32, #tpu.memory_space<vmem>>, vector<1x4xf32>
    %381 = vector.broadcast %380 : vector<1x4xf32> to vector<16x4xf32>
    %382 = arith.addf %379, %381 : vector<16x4xf32>
    %383 = arith.addf %382, %77 : vector<16x4xf32>
    %c0_152 = arith.constant 0 : index
    %c0_153 = arith.constant 0 : index
    %384 = vector.load %arg3[%c0_152, %c0_153] : memref<16x4xf32, #tpu.memory_space<vmem>>, vector<16x4xf32>
    tpu.vector_store %arg3[%c0_152, %c0_153], %383 {strides = array<i32>} : memref<16x4xf32, #tpu.memory_space<vmem>>, vector<16x4xf32>,
    return
  }
  func.func @transform_0(%arg0: i32) -> (i32, i32) {
    %c0_i32 = arith.constant 0 : i32
    %c0_i32_0 = arith.constant 0 : i32
    %c0_i32_1 = arith.constant 0 : i32
    return %c0_i32, %c0_i32_0 : i32, i32
  }
  func.func @transform_1(%arg0: i32) -> (i32, i32) {
    %c0_i32 = arith.constant 0 : i32
    %c0_i32_0 = arith.constant 0 : i32
    %c0_i32_1 = arith.constant 0 : i32
    return %c0_i32, %c0_i32_0 : i32, i32
  }
  func.func @transform_2(%arg0: i32) -> (i32, i32) {
    %c0_i32 = arith.constant 0 : i32
    %c0_i32_0 = arith.constant 0 : i32
    %c0_i32_1 = arith.constant 0 : i32
    return %c0_i32, %c0_i32_0 : i32, i32
  }
}

</mosaic_0001>

<bundles_post_ra>
// kernel: tpu_custom_call.1
= control target key start
LH: loop header
LB: loop body
LE: loop exit
PB: predicated region body
PF: predicated region fallthrough
CT: control target
= control target key end

     0   :  { %v3333_v0 = vmov 0   ;;  %v29_v6 = vlaneseq  ;;  %vm240_vm5 = vcmask 1043456   ;;  %vm233_vm8 = vcmask 31744   ;;  %s4157_s1 = inlined_call_operand.vmem [shape: f32[1080,64], index: 1, kind: input, shape index: {}]   ;;  %s4158_s0 = inlined_call_operand.vmem [shape: f32[32,4], index: 0, kind: input, shape index: {}]   ;;  %s4159_s2 = inlined_call_operand.vmem [shape: f32[16,4], index: 2, kind: output, shape index: {}]  }
   0x1   :  { %3268 = vset.pattern.permute.xlu1 %v3333_v0  ;;  %3267 = vset.pattern.permute.xlu0 %v3333_v0  ;;  %v22_v1 = vld [vmem:[%s4157_s1 + $0x38] sm:$0xff]  ;;  %v21_v2 = vld [vmem:[%s4157_s1 + $0x30] sm:$0xff]  ;;  %v23_v5 = vld [vmem:[%s4157_s1 + $0x40] sm:$0xff]  ;;  %vm579_vm9 = vcmask 261120   ;;  %vm974_vm11 = vcmask 130048   ;;  %vm2321_vm12 = vcmask 523264  }
   0x2   :  { %178 = vperm.xlu1 %3268, %v22_v1   ;;  %v184_v3 = vsub.f32 1.0, %v22_v1  ;;  %173 = vperm.xlu0 %3267, %v21_v2   ;;  %v183_v4 = vsub.f32 1.0, %v21_v2  ;;  %v215_v7 = vsub.f32 1.0, %v23_v5  ;;  %v24_v8 = vld [vmem:[%s4157_s1 + $0x48] sm:$0xff]  ;;  %v3361_v9 = vshrl.u32 %v29_v6, 7  ;;  %v25_v11 = vld [vmem:[%s4157_s1 + $0x50] sm:$0xff]  ;;  %vm3700_vm10 = vmpackc.low %vm579_vm9, %vm579_vm9 }
   0x3   :  { %v216_v10 = vsub.f32 1.0, %v24_v8  ;;  %v26_v12 = vld [vmem:[%s4157_s1 + $0x58] sm:$0xff]  ;;  %v38_v13 = vld [vmem:[%s4157_s1 + $0x60] sm:$0xff]  ;;  %v39_v14 = vld [vmem:[%s4157_s1 + $0x68] sm:$0xff] }
   0x4   :  { %vm31_vm0 = vcmp.lt.s32.totalorder %v3361_v9, 7  ;;  %vm42_vm1 = vcmp.lt.s32.totalorder %v3361_v9, 6  ;;  %vm53_vm2 = vcmp.lt.s32.totalorder %v3361_v9, 5  ;;  %vm64_vm3 = vcmp.lt.s32.totalorder %v3361_v9, 4  ;;  %v3385_v15 = vld [vmem:[%s4158_s0] sm:$0xff]  ;;  %v3390_v16 = vld [vmem:[%s4158_s0 + $0x8] sm:$0xff] }
   0x5   :  { %vm75_vm4 = vcmp.lt.s32.totalorder %v3361_v9, 3  ;;  %vm86_vm6 = vcmp.lt.s32.totalorder %v3361_v9, 2  ;;  %vm97_vm7 = vcmp.lt.s32.totalorder %v3361_v9, 1  ;;  %v231_v17 = vld [vmem:[%s4157_s1 + $0x148] sm:$0xf]  ;;  %v27_v18 = vrot.slane %v3385_v15, 1 }
   0x6   :  { %192 = vperm.xlu1 %3268, %v184_v3   ;;  %187 = vperm.xlu0 %3267, %v183_v4   ;;  %v28_v19 = vrot.slane %v3390_v16, 1  ;;  %v40_v20 = vrot.slane %v3385_v15, 2  ;;  %v41_v21 = vrot.slane %v3390_v16, 2  ;;  %v3402_v22 = vld [vmem:[%s4157_s1 + $0x158] sm:$0xf]  ;;  %v49_v23 = vld [vmem:[%s4157_s1 + $0x70] sm:$0xff] }
   0x7   :  { %v51_v24 = vrot.slane %v3385_v15, 3  ;;  %v52_v25 = vrot.slane %v3390_v16, 3  ;;  %v62_v26 = vrot.slane %v3385_v15, 4  ;;  %v63_v27 = vrot.slane %v3390_v16, 4  ;;  %2895 = vmatprep.subr.msk.mxu0 %vm240_vm5, %v231_v17  ;;  %v50_v28 = vld [vmem:[%s4157_s1 + $0x78] sm:$0xff]  ;;  %v60_v29 = vld [vmem:[%s4157_s1 + $0x80] sm:$0xff] }
   0x8   :  { %v61_v30 = vld [vmem:[%s4157_s1 + $0x88] sm:$0xff]  ;;  %v3423_v31 = vsel %vm31_vm0, %v27_v18, %v28_v19  ;;  %v3427_v32 = vsel %vm31_vm0, %v28_v19, %v27_v18  ;;  %v3431_v33 = vsel %vm42_vm1, %v40_v20, %v41_v21  ;;  %v3435_v34 = vsel %vm42_vm1, %v41_v21, %v40_v20  ;;  %2896 = vmatpush3.msk.msra.mxu0 %vm240_vm5, %v231_v17  ;;  %v71_v39 = vld [vmem:[%s4157_s1 + $0x90] sm:$0xff]  ;;  %v104_v40 = vld [vmem:[%s4157_s1 + $0xc0] sm:$0xff] }
   0x9   :  { %v34_v35 = vmul.f32 %v3427_v32, %v25_v11  ;;  %v35_v36 = vmul.f32 %v3423_v31, %v26_v12  ;;  %v45_v37 = vmul.f32 %v3435_v34, %v38_v13  ;;  %v46_v38 = vmul.f32 %v3431_v33, %v39_v14  ;;  %2900 = vmatprep.subr.msk.mxu0 %vm240_vm5, %v3402_v22  ;;  %v105_v41 = vld [vmem:[%s4157_s1 + $0xc8] sm:$0xff]  ;;  %v72_v46 = vld [vmem:[%s4157_s1 + $0x98] sm:$0xff]  ;;  %v82_v47 = vld [vmem:[%s4157_s1 + $0xa0] sm:$0xff] }
   0xa   :  { %219 = vperm.xlu1 %3268, %v215_v7   ;;  %205 = vperm.xlu0 %3267, %v23_v5   ;;  %v54_v42 = vsel %vm53_vm2, %v51_v24, %v52_v25  ;;  %v55_v43 = vsel %vm53_vm2, %v52_v25, %v51_v24  ;;  %v3459_v44 = vsel %vm64_vm3, %v62_v26, %v63_v27  ;;  %v83_v48 = vld [vmem:[%s4157_s1 + $0xa8] sm:$0xff]  ;;  %v73_v53 = vrot.slane %v3385_v15, 5  ;;  %v232_v57 = vld [vmem:[%s4157_s1 + $0x150] sm:$0xf]  ;;  %v94_v63 = vld [vmem:[%s4157_s1 + $0xb8] sm:$0xff] }
   0xb   :  { %v3463_v45 = vsel %vm64_vm3, %v63_v27, %v62_v26  ;;  %v56_v49 = vmul.f32 %v55_v43, %v49_v23  ;;  %v57_v50 = vmul.f32 %v54_v42, %v50_v28  ;;  %v68_v52 = vmul.f32 %v3459_v44, %v61_v30  ;;  %2890 = vmatprep.subr.msk.mxu1 %vm240_vm5, %v232_v57  ;;  %v93_v62 = vld [vmem:[%s4157_s1 + $0xb0] sm:$0xff]  ;;  %v111_v5 = vld [vmem:[%s4157_s1 + $0xd8] sm:$0xff]  ;;  %v116_v6 = vld [vmem:[%s4157_s1 + $0xe0] sm:$0xff] }
   0xc   :  { %v67_v51 = vmul.f32 %v3463_v45, %v60_v29  ;;  %v74_v54 = vrot.slane %v3390_v16, 5  ;;  %v84_v55 = vrot.slane %v3385_v15, 6  ;;  %v85_v56 = vrot.slane %v3390_v16, 6  ;;  %2891 = vmatpush3.msk.msra.mxu1 %vm240_vm5, %v232_v57  ;;  %v110_v4 = vld [vmem:[%s4157_s1 + $0xd0] sm:$0xff]  ;;  %v117_v12 = vld [vmem:[%s4157_s1 + $0xe8] sm:$0xff]  ;;  %v123_v14 = vld [vmem:[%s4157_s1 + $0xf8] sm:$0xff] }
   0xd   :  { %v95_v58 = vrot.slane %v3385_v15, 7  ;;  %v96_v59 = vrot.slane %v3390_v16, 7  ;;  %v106_v60 = vmul.f32 %v104_v40, %v3385_v15  ;;  %v107_v61 = vmul.f32 %v105_v41, %v3390_v16  ;;  %v122_v13 = vld [vmem:[%s4157_s1 + $0xf0] sm:$0xff]  ;;  %v128_v26 = vld [vmem:[%s4157_s1 + $0x100] sm:$0xff]  ;;  %v129_v27 = vld [vmem:[%s4157_s1 + $0x108] sm:$0xff] }
   0xe   :  { %224 = vperm.xlu1 %3268, %v216_v10   ;;  %210 = vperm.xlu0 %3267, %v24_v8   ;;  %v76_v0 = vsel %vm75_vm4, %v73_v53, %v74_v54  ;;  %v77_v1 = vsel %vm75_vm4, %v74_v54, %v73_v53  ;;  %v87_v2 = vsel %vm86_vm6, %v84_v55, %v85_v56  ;;  %v1978_v9 = vld [vmem:[%s4157_s1 + $0x2a8] sm:$0xff] }
   0xf   :  { %v88_v3 = vsel %vm86_vm6, %v85_v56, %v84_v55  ;;  %v78_v7 = vmul.f32 %v77_v1, %v71_v39  ;;  %v79_v8 = vmul.f32 %v76_v0, %v72_v46  ;;  %v90_v11 = vmul.f32 %v87_v2, %v83_v48 }
  0x10   :  { %v89_v10 = vmul.f32 %v88_v3, %v82_v47  ;;  %v98_v17 = vsel %vm97_vm7, %v95_v58, %v96_v59  ;;  %v99_v18 = vsel %vm97_vm7, %v96_v59, %v95_v58  ;;  %v108_v19 = vadd.f32 %v106_v60, %v67_v51 }
  0x11   :  { %v109_v20 = vadd.f32 %v107_v61, %v68_v52  ;;  %v80_v21 = vadd.f32 %v78_v7, %v34_v35  ;;  %v81_v23 = vadd.f32 %v79_v8, %v35_v36  ;;  %v92_v25 = vadd.f32 %v90_v11, %v46_v38  ;;  %v134_v35 = vld [vmem:[%s4157_s1 + $0x110] sm:$0xff]  ;;  %v135_v36 = vld [vmem:[%s4157_s1 + $0x118] sm:$0xff] }
  0x12   :  { %v91_v24 = vadd.f32 %v89_v10, %v45_v37  ;;  %v100_v28 = vmul.f32 %v99_v18, %v93_v62  ;;  %v101_v29 = vmul.f32 %v98_v17, %v94_v63  ;;  %v112_v30 = vmul.f32 %v110_v4, %v3423_v31  ;;  %v140_v31 = vld [vmem:[%s4157_s1 + $0x120] sm:$0xff] }
  0x13   :  { %v113_v39 = vmul.f32 %v111_v5, %v3427_v32  ;;  %v118_v37 = vmul.f32 %v116_v6, %v3431_v33  ;;  %v119_v38 = vmul.f32 %v117_v12, %v3435_v34  ;;  %v124_v40 = vmul.f32 %v122_v13, %v54_v42  ;;  %v141_v32 = vld [vmem:[%s4157_s1 + $0x128] sm:$0xff]  ;;  %v146_v33 = vld [vmem:[%s4157_s1 + $0x130] sm:$0xff]  ;;  %v147_v34 = vld [vmem:[%s4157_s1 + $0x138] sm:$0xff] }
  0x14   :  { %v125_v41 = vmul.f32 %v123_v14, %v55_v43  ;;  %v102_v46 = vadd.f32 %v100_v28, %v56_v49  ;;  %v103_v47 = vadd.f32 %v101_v29, %v57_v50  ;;  %v114_v48 = vadd.f32 %v112_v30, %v80_v21 }
  0x15   :  { %v115_v51 = vadd.f32 %v113_v39, %v81_v23  ;;  %v120_v42 = vadd.f32 %v118_v37, %v91_v24  ;;  %v121_v43 = vadd.f32 %v119_v38, %v92_v25  ;;  %v130_v52 = vmul.f32 %v128_v26, %v3459_v44 }
  0x16   :  { %v131_v53 = vmul.f32 %v129_v27, %v3463_v45  ;;  %v126_v54 = vadd.f32 %v124_v40, %v102_v46  ;;  %v127_v55 = vadd.f32 %v125_v41, %v103_v47  ;;  %v136_v49 = vmul.f32 %v134_v35, %v76_v0  ;;  %v2685_v0 = vld [vmem:[%s4157_s1 + $0x140] ss:$0 sm:$0xff] }
  0x17   :  { %v137_v50 = vmul.f32 %v135_v36, %v77_v1  ;;  %v132_v56 = vadd.f32 %v130_v52, %v108_v19  ;;  %v142_v58 = vmul.f32 %v140_v31, %v87_v2  ;;  %v143_v59 = vmul.f32 %v141_v32, %v88_v3  ;;  %v490_v41 = vld [vmem:[%s4157_s1 + $0x160] sm:$0xf] }
  0x18   :  { %v133_v57 = vadd.f32 %v131_v53, %v109_v20  ;;  %v138_v60 = vadd.f32 %v136_v49, %v114_v48  ;;  %v148_v62 = vmul.f32 %v146_v33, %v98_v17  ;;  %v149_v63 = vmul.f32 %v147_v34, %v99_v18  ;;  %v13_v33 = vld [vmem:[%s4158_s0 + $0x10] sm:$0xff] }
  0x19   :  { %v139_v61 = vadd.f32 %v137_v50, %v115_v51  ;;  %v144_v4 = vadd.f32 %v142_v58, %v120_v42  ;;  %v145_v5 = vadd.f32 %v143_v59, %v121_v43 }
  0x1a   :  { %v150_v6 = vadd.f32 %v148_v62, %v126_v54  ;;  %v151_v7 = vadd.f32 %v149_v63, %v127_v55 }
  0x1b   :  { %v152_v8 = vadd.f32 %v144_v4, %v138_v60  ;;  %v153_v44 = vadd.f32 %v145_v5, %v139_v61  ;;  %v623_v5 = vld [vmem:[%s4157_s1 + $0x188] sm:$0xff] }
  0x1c   :  { %v154_v10 = vadd.f32 %v150_v6, %v132_v56  ;;  %v155_v45 = vadd.f32 %v151_v7, %v133_v57  ;;  %v624_v6 = vld [vmem:[%s4157_s1 + $0x190] sm:$0xff] }
  0x1d   :  { %v3106_v7 = vpack.c.bf16 %v624_v6, %v623_v5 }
  0x1e   :  { %v156_v1 = vadd.f32 %v154_v10, %v152_v8  ;;  %v157_v11 = vadd.f32 %v155_v45, %v153_v44  ;;  %v797_v8 = vld [vmem:[%s4157_s1 + $0x1d8] sm:$0xff]  ;;  %v798_v44 = vld [vmem:[%s4157_s1 + $0x1e0] sm:$0xff] }
  0x1f   :  { %v3122_v10 = vpack.c.bf16 %v798_v44, %v797_v8  ;;  %3107 = vmatprep.subr.bf16.mxu1 %v3106_v7  ;;  %v625_v45 = vld [vmem:[%s4157_s1 + $0x198] sm:$0xff] }
  0x20   :  { %v3558_v2 = vadd.f32 %v2685_v0, %v156_v1  ;;  %v3560_v3 = vadd.f32 %v2685_v0, %v157_v11  ;;  %v626_v0 = vld [vmem:[%s4157_s1 + $0x1a0] sm:$0xff]  ;;  %v799_v11 = vld [vmem:[%s4157_s1 + $0x1e8] sm:$0xff] }
  0x21   :  { %v3110_v1 = vpack.c.bf16 %v626_v0, %v625_v45 }
  0x22   :  { %v165_v12 = vsub.f32 %v3385_v15, %v3558_v2  ;;  %v166_v13 = vsub.f32 %v3390_v16, %v3560_v3 }
  0x24   :  { %v167_v14 = vrot.slane %v165_v12, 7  ;;  %v168_v17 = vrot.slane %v166_v13, 7  ;;  %v199_v18 = vrot.slane %v165_v12, 1  ;;  %v200_v19 = vrot.slane %v166_v13, 1  ;;  %2892 = vmatprep.mubr.msk.f32.mxu1 %vm233_vm8, %v165_v12  ;;  %v800_v12 = vld [vmem:[%s4157_s1 + $0x1f0] sm:$0xff] }
  0x25   :  { %2893 = vmatmul.mubr.msk.f32.vlgmr.msra.gmra.mrb[0].mxu1 %vm233_vm8, %v166_v13  ;;  %v3126_v13 = vpack.c.bf16 %v800_v12, %v799_v11 }
  0x26   :  { %v169_v20 = vsel %vm97_vm7, %v167_v14, %v168_v17  ;;  %v170_v21 = vsel %vm97_vm7, %v168_v17, %v167_v14  ;;  %v202_v15 = vsel %vm31_vm0, %v200_v19, %v199_v18  ;;  %v201_v16 = vsel %vm31_vm0, %v199_v18, %v200_v19  ;;  %3109 = vmatpush3.bf16.msra.mxu1 %v3106_v7  ;;  %v713_v14 = vld [vmem:[%s4157_s1 + $0x1b0] sm:$0xff]  ;;  %v714_v17 = vld [vmem:[%s4157_s1 + $0x1b8] sm:$0xff] }
  0x27   :  { %3111 = vmatprep.subr.bf16.mxu1 %v3110_v1  ;;  %v3114_v18 = vpack.c.bf16 %v714_v17, %v713_v14 }
  0x2a   :  { %3113 = vmatpush3.bf16.msra.mxu1 %v3110_v1 }
  0x2b   :  { %3115 = vmatprep.subr.bf16.mxu1 %v3114_v18 }
  0x81   :  { %v179_v23 = vpop.permute.xlu1 %178  ;;  %v174_v24 = vpop.permute.xlu0 %173 }
  0x82   :  { %v182_v27 = vmul.f32 %v179_v23, %v169_v20  ;;  %v181_v28 = vmul.f32 %v174_v24, %v170_v21 }
  0x85   :  { %v193_v25 = vpop.permute.xlu1 %192  ;;  %v188_v26 = vpop.permute.xlu0 %187 }
  0x86   :  { %v196_v29 = vmul.f32 %v193_v25, %v170_v21  ;;  %v195_v30 = vmul.f32 %v188_v26, %v169_v20  ;;  %v2698_v25 = vld [vmem:[%s4157_s1 + $0x178] ss:$0 sm:$0xff] }
  0x88   :  { %v198_v39 = vadd.f32 %v196_v29, %v182_v27  ;;  %v197_v35 = vadd.f32 %v195_v30, %v181_v28  ;;  %v2699_v27 = vld [vmem:[%s4157_s1 + $0x180] ss:$0 sm:$0xff]  ;;  %v619_v30 = vld [vmem:[%s4157_s1 + $0x168] sm:$0xff] }
  0x89   :  { %v220_v36 = vpop.permute.xlu1 %219  ;;  %v206_v37 = vpop.permute.xlu0 %205 }
  0x8a   :  { %v227_v38 = vmul.f32 %v220_v36, %v202_v15  ;;  %v213_v40 = vmul.f32 %v206_v37, %v201_v16  ;;  %2897 = vmatprep.mubr.msk.f32.mxu0 %vm233_vm8, %v197_v35 }
  0x8b   :  { %2898 = vmatmul.mubr.msk.f32.vlgmr.msra.gmra.mrb[0].mxu0 %vm233_vm8, %v198_v39 }
  0x8c   :  { %v229_v31 = vadd.f32 %v227_v38, %v213_v40  ;;  %2901 = vmatpush3.msk.msra.mxu0 %vm240_vm5, %v3402_v22  ;;  %v14_v22 = vld [vmem:[%s4158_s0 + $0x18] sm:$0xff]  ;;  %v620_v38 = vld [vmem:[%s4157_s1 + $0x170] sm:$0xff]  ;;  %v715_v40 = vld [vmem:[%s4157_s1 + $0x1c0] sm:$0xff] }
  0x8d   :  { %v225_v32 = vpop.permute.xlu1 %224  ;;  %v211_v46 = vpop.permute.xlu0 %210  ;;  %2905 = vmatprep.subr.msk.mxu0 %vm240_vm5, %v490_v41 }
  0x8e   :  { %v228_v47 = vmul.f32 %v225_v32, %v201_v16  ;;  %v214_v48 = vmul.f32 %v211_v46, %v202_v15  ;;  %2902 = vmatprep.mubr.msk.f32.mxu0 %vm233_vm8, %v229_v31 }
  0x90   :  { %v230_v51 = vadd.f32 %v228_v47, %v214_v48  ;;  %v2706_v47 = vld [vmem:[%s4157_s1 + $0x1f8] ss:$0 sm:$0xff]  ;;  %v2700_v48 = vld [vmem:[%s4157_s1 + $0x1a8] ss:$0 sm:$0xff] }
  0x93   :  { %2903 = vmatmul.mubr.msk.f32.vlgmr.msra.gmra.mrb[0].mxu0 %vm233_vm8, %v230_v51 }
  0x94   :  { %2906 = vmatpush3.msk.msra.mxu0 %vm240_vm5, %v490_v41  ;;  %2907 = vmatprep.mubr.msk.f32.mxu0 %vm233_vm8, %v13_v33  ;;  %v716_v41 = vld [vmem:[%s4157_s1 + $0x1c8] sm:$0xff] }
  0x95   :  { %3123 = vmatprep.subr.bf16.mxu0 %v3122_v10  ;;  %v3118_v46 = vpack.c.bf16 %v716_v41, %v715_v40 }
  0x9b   :  { %2908 = vmatmul.mubr.msk.f32.vlgmr.msra.gmra.mrb[0].mxu0 %vm233_vm8, %v14_v22  ;;  %v2709_v22 = vld [vmem:[%s4157_s1 + $0x10] ss:$0 sm:$0xff] }
  0x9c   :  { %3125 = vmatpush3.bf16.msra.mxu0 %v3122_v10 }
  0x9d   :  { %3127 = vmatprep.subr.bf16.mxu0 %v3126_v13 }
  0xa0   :  { %3129 = vmatpush3.bf16.msra.mxu0 %v3126_v13 }
  0xf8   :  { %v2894_v34 = vpop.f32.mrb[0].mxu1 }
  0xf9   :  { %v310_v42 = vpop.f32.mrb[1].mxu1 }
 0x16e   :  { %v2909_v43 = vpop.f32.mrb[0].mxu0 }
 0x16f   :  { %v3595_v52 = vadd.f32 %v2909_v43, %v2894_v34  ;;  %v566_v53 = vpop.f32.mrb[1].mxu0  ;;  %v2714_v34 = vld [vmem:[%s4157_s1 + $0x18] ss:$0 sm:$0xff] }
 0x170   :  { %v3597_v54 = vadd.f32 %v566_v53, %v310_v42 }
 0x171   :  { %v583_v55 = vsel %vm579_vm9, %v3595_v52, 0.0 }
 0x172   :  { %584 = vadd.xlane.f32.xlu1 %v583_v55  ;;  %v580_v49 = vsel %vm579_vm9, %v3597_v54, 0.0  ;;  %v2723_v55 = vld [vmem:[%s4157_s1 + $0x20] ss:$0 sm:$0xff] }
 0x173   :  { %581 = vadd.xlane.f32.xlu0 %v580_v49 }
 0x1ff   :  { %v585_v50 = vpop.xlane.xlu1 %584 }
 0x200   :  { %v588_v56 = vmul.f32 0.03125, %v585_v50  ;;  %v582_v57 = vpop.xlane.xlu0 %581 }
 0x201   :  { %v587_v58 = vmul.f32 0.03125, %v582_v57 }
 0x202   :  { %v590_v59 = vsub.f32 %v3595_v52, %v588_v56  ;;  %v3681_v56 = vld [vmem:[%s4157_s1 + $0x28] ss:$0 sm:$0xff] }
 0x203   :  { %v589_v60 = vsub.f32 %v3597_v54, %v587_v58 }
 0x204   :  { %v592_v63 = vmul.f32 %v590_v59, %v590_v59 }
 0x205   :  { %v591_v61 = vmul.f32 %v589_v60, %v589_v60 }
 0x206   :  { %v596_v4 = vsel %vm579_vm9, %v592_v63, 0.0 }
 0x207   :  { %v593_v62 = vsel %vm579_vm9, %v591_v61, 0.0 }
 0x208   :  { %594 = vadd.xlane.f32.xlu0 %v593_v62 }
 0x20c   :  { %597 = vadd.xlane.f32.xlu0 %v596_v4  ;;  %v2703_v4 = vld [vmem:[%s4157_s1 + $0x1d0] ss:$0 sm:$0xff] }
 0x295   :  { %v595_v19 = vpop.xlane.xlu0 %594 }
 0x296   :  { %v599_v20 = vmul.f32 0.03125, %v595_v19 }
 0x298   :  { %v601_v21 = vadd.f32 1e-05, %v599_v20 }
 0x299   :  { %v598_v15 = vpop.xlane.xlu0 %597 }
 0x29a   :  { %3269 = vrsqrt.f32 %v601_v21  ;;  %v600_v16 = vmul.f32 0.03125, %v598_v15  ;;  %v3738_v15 = vld [vmem:[%s4157_s1 + $0x8] sm:$0xff] }
 0x29c   :  { %v602_v23 = vadd.f32 1e-05, %v600_v16  ;;  %v3743_v16 = vld [vmem:[%s4157_s1] sm:$0xff] }
 0x29e   :  { %3271 = vrsqrt.f32 %v602_v23 }
 0x2a4   :  { %v3270_v24 = vpop.eup %3269 }
 0x2a5   :  { %v605_v26 = vmul.f32 %v3270_v24, %v589_v60 }
 0x2a7   :  { %v611_v28 = vmul.f32 %v2698_v25, %v605_v26 }
 0x2a8   :  { %v3272_v29 = vpop.eup %3271 }
 0x2a9   :  { %v606_v39 = vmul.f32 %v3272_v29, %v590_v59  ;;  %v617_v35 = vadd.f32 %v2699_v27, %v611_v28 }
 0x2ab   :  { %v612_v36 = vmul.f32 %v2698_v25, %v606_v39  ;;  %v621_v37 = vadd.f32 %v619_v30, %v617_v35 }
 0x2ad   :  { %v618_v31 = vadd.f32 %v2699_v27, %v612_v36  ;;  %2918 = vmatprep.mubr.msk.f32.mxu1 %vm579_vm9, %v621_v37  ;;  %2940 = vmatprep.mubr.msk.f32.mxu0 %vm579_vm9, %v621_v37 }
 0x2af   :  { %v622_v32 = vadd.f32 %v620_v38, %v618_v31 }
 0x2b1   :  { %2919 = vmatmul.mubr.msk.f32.vlgmr.msra.gmra.mrb[2].mxu1 %vm579_vm9, %v622_v32  ;;  %2941 = vmatmul.mubr.msk.f32.vlgmr.msra.gmra.mrb[2].mxu0 %vm579_vm9, %v622_v32 }
 0x2b2   :  { %3117 = vmatpush3.bf16.msra.mxu1 %v3114_v18  ;;  %2929 = vmatprep.mubr.msk.f32.mxu1 %vm579_vm9, %v621_v37 }
 0x2b3   :  { %3119 = vmatprep.subr.bf16.mxu1 %v3118_v46 }
 0x2b6   :  { %3121 = vmatpush3.bf16.msra.mxu1 %v3118_v46 }
 0x2b9   :  { %2930 = vmatmul.mubr.msk.f32.vlgmr.msra.gmra.mrb[4].mxu1 %vm579_vm9, %v622_v32 }
 0x384   :  { %v2920_v51 = vpop.f32.mrb[2].mxu1  ;;  %v2942_v33 = vpop.f32.mrb[2].mxu0 }
 0x385   :  { %v878_v42 = vadd.f32 %v2942_v33, %v2706_v47  ;;  %v704_v43 = vpop.f32.mrb[3].mxu1  ;;  %v872_v53 = vpop.f32.mrb[3].mxu0  ;;  %v3718_v17 = vadd.f32 %v2920_v51, %v2700_v48 }
 0x386   :  { %v3676_v49 = vadd.f32 %v2700_v48, %v704_v43  ;;  %v873_v50 = vadd.f32 %v2706_v47, %v872_v53 }
 0x387   :  { %v1109_v60 = vmul.f32 %v2714_v34, %v878_v42  ;;  %v998_v62 = vmul.f32 %v2709_v22, %v878_v42  ;;  %v1382_v6 = vmul.f32 %v2723_v55, %v878_v42  ;;  %v1576_v44 = vmul.f32 %v3681_v56, %v878_v42 }
 0x388   :  { %v885_v57 = vmul.f32 %v2709_v22, %v3676_v49  ;;  %v1003_v58 = vmul.f32 %v2714_v34, %v3676_v49  ;;  %v1108_v59 = vmul.f32 %v2714_v34, %v873_v50  ;;  %v997_v61 = vmul.f32 %v2709_v22, %v873_v50 }
 0x389   :  { %v1381_v63 = vmul.f32 %v2723_v55, %v873_v50  ;;  %v1575_v8 = vmul.f32 %v3681_v56, %v873_v50  ;;  %v886_v18 = vmul.f32 %v2709_v22, %v3718_v17  ;;  %v1004_v19 = vmul.f32 %v2714_v34, %v3718_v17 }
 0x38a   :  { %2947 = vmatprep.mubr.msk.f32.mxu1 %vm579_vm9, %v885_v57  ;;  %2954 = vmatprep.mubr.msk.f32.mxu0 %vm579_vm9, %v1003_v58  ;;  %v3142_v5 = vpack.c.bf16 %v1109_v60, %v1108_v59  ;;  %v3690_v7 = vpack.c.bf16 %v998_v62, %v997_v61  ;;  %v1276_v20 = vmul.f32 %v2723_v55, %v3676_v49 }
 0x38b   :  { %v3694_v45 = vpack.c.bf16 %v1382_v6, %v1381_v63  ;;  %v3696_v11 = vpack.c.bf16 %v1576_v44, %v1575_v8  ;;  %v1277_v21 = vmul.f32 %v2723_v55, %v3718_v17 }
 0x38c   :  { %v2931_v10 = vpop.f32.mrb[4].mxu1 }
 0x38d   :  { %v794_v0 = vadd.f32 %v2931_v10, %v2703_v4  ;;  %v788_v1 = vpop.f32.mrb[5].mxu1 }
 0x38e   :  { %v789_v12 = vadd.f32 %v2703_v4, %v788_v1 }
 0x390   :  { %v3704_v14 = vpack.c.bf16 %v794_v0, %v789_v12 }
 0x392   :  { %3132 = vmatprep.subr.msk.bf16.mxu1 %vm3700_vm10, %v3704_v14  ;;  %3138 = vmatprep.subr.msk.bf16.mxu0 %vm3700_vm10, %v3704_v14 }
 0x393   :  { %3135 = vmatpush3.bf16.xpose.msk.msra.mxu1 %vm3700_vm10, %v3704_v14  ;;  %3141 = vmatpush3.bf16.xpose.msk.msra.mxu0 %vm3700_vm10, %v3704_v14 }
 0x394   :  { %3143 = vmatprep.subr.bf16.mxu1 %v3142_v5  ;;  %3152 = vmatprep.subr.msk.bf16.mxu0 %vm3700_vm10, %v3704_v14 }
 0x39a   :  { %2948 = vmatmul.mubr.msk.f32.vlgmr.msra.gmra.mrb[6].mxu1 %vm579_vm9, %v886_v18  ;;  %2955 = vmatmul.mubr.msk.f32.vlgmr.msra.gmra.mrb[4].mxu0 %vm579_vm9, %v1004_v19 }
 0x39b   :  { %3145 = vmatpush3.bf16.msra.mxu1 %v3142_v5  ;;  %3155 = vmatpush3.bf16.xpose.msk.msra.mxu0 %vm3700_vm10, %v3704_v14 }
 0x39c   :  { %2975 = vmatprep.mubr.msk.f32.mxu0 %vm579_vm9, %v1276_v20  ;;  %3147 = vmatprep.subr.bf16.mxu1 %v3690_v7 }
 0x3a2   :  { %2976 = vmatmul.mubr.msk.f32.vlgmr.msra.gmra.mrb[6].mxu0 %vm579_vm9, %v1277_v21 }
 0x46d   :  { %v2949_v23 = vpop.f32.mrb[6].mxu1  ;;  %v2956_v24 = vpop.f32.mrb[4].mxu0 }
 0x46e   :  { %v1083_v25 = vadd.f32 %v2956_v24, %v3738_v15  ;;  %v965_v26 = vpop.f32.mrb[7].mxu1  ;;  %v1077_v27 = vpop.f32.mrb[5].mxu0  ;;  %v971_v29 = vadd.f32 %v2949_v23, %v3738_v15 }
 0x46f   :  { %v1078_v28 = vadd.f32 %v1077_v27, %v3743_v16  ;;  %v966_v39 = vadd.f32 %v965_v26, %v3743_v16 }
 0x470   :  { %v1089_v30 = vsel %vm974_vm11, %v1083_v25, -inf  ;;  %v978_v36 = vsel %vm974_vm11, %v971_v29, -inf }
 0x471   :  { %1090 = vmax.xlane.f32.xlu0 %v1089_v30  ;;  %v1086_v35 = vsel %vm974_vm11, %v1078_v28, -inf  ;;  %v975_v38 = vsel %vm974_vm11, %v966_v39, -inf }
 0x472   :  { %1087 = vmax.xlane.f32.xlu1 %v1086_v35 }
 0x475   :  { %v2977_v37 = vpop.f32.mrb[6].mxu0  ;;  %979 = vmax.xlane.f32.xlu0 %v978_v36 }
 0x476   :  { %v1356_v40 = vadd.f32 %v2977_v37, %v3738_v15  ;;  %v1350_v41 = vpop.f32.mrb[7].mxu0  ;;  %976 = vmax.xlane.f32.xlu1 %v975_v38 }
 0x477   :  { %v1351_v31 = vadd.f32 %v1350_v41, %v3743_v16 }
 0x478   :  { %v1362_v32 = vsel %vm974_vm11, %v1356_v40, -inf }
 0x479   :  { %1363 = vmax.xlane.f32.xlu0 %v1362_v32  ;;  %v1359_v46 = vsel %vm974_vm11, %v1351_v31, -inf  ;;  %v1470_v32 = vmul.f32 %v3681_v56, %v3676_v49 }
 0x47a   :  { %1360 = vmax.xlane.f32.xlu1 %v1359_v46 }
 0x4fe   :  { %v1091_v47 = vpop.xlane.xlu0 %1090 }
 0x4ff   :  { %v1093_v48 = vsub.f32 %v1083_v25, %v1091_v47  ;;  %v1088_v51 = vpop.xlane.xlu1 %1087 }
 0x500   :  { %v1092_v33 = vsub.f32 %v1078_v28, %v1088_v51 }
 0x501   :  { %v1096_v22 = vmul.f32 1.442695, %v1093_v48 }
 0x502   :  { %v1094_v34 = vmul.f32 1.442695, %v1092_v33  ;;  %v980_v42 = vpop.xlane.xlu0 %979 }
 0x503   :  { %3273 = vpow2.f32 %v1096_v22  ;;  %v982_v43 = vsub.f32 %v971_v29, %v980_v42  ;;  %v977_v53 = vpop.xlane.xlu1 %976 }
 0x504   :  { %3275 = vpow2.f32 %v1094_v34  ;;  %v981_v55 = vsub.f32 %v966_v39, %v977_v53  ;;  %v1661_v53 = vld [vmem:[%s4157_s1 + $0x208] sm:$0xff] }
 0x505   :  { %v985_v50 = vmul.f32 1.442695, %v982_v43  ;;  %v1660_v43 = vld [vmem:[%s4157_s1 + $0x200] sm:$0xff] }
 0x506   :  { %v983_v57 = vmul.f32 1.442695, %v981_v55  ;;  %v1364_v58 = vpop.xlane.xlu0 %1363  ;;  %v1662_v55 = vld [vmem:[%s4157_s1 + $0x210] sm:$0xff] }
 0x507   :  { %3277 = vpow2.f32 %v985_v50  ;;  %v1366_v59 = vsub.f32 %v1356_v40, %v1364_v58  ;;  %v1361_v60 = vpop.xlane.xlu1 %1360  ;;  %v3170_v50 = vpack.c.bf16 %v1661_v53, %v1660_v43  ;;  %v1967_v53 = vld [vmem:[%s4157_s1 + $0x290] sm:$0xff] }
 0x508   :  { %3279 = vpow2.f32 %v983_v57  ;;  %v1365_v61 = vsub.f32 %v1351_v31, %v1361_v60  ;;  %v1663_v57 = vld [vmem:[%s4157_s1 + $0x218] sm:$0xff] }
 0x509   :  { %v1369_v62 = vmul.f32 1.442695, %v1366_v59  ;;  %v3174_v58 = vpack.c.bf16 %v1663_v57, %v1662_v55  ;;  %3171 = vmatprep.subr.bf16.mxu0 %v3170_v50 }
 0x50a   :  { %v1367_v63 = vmul.f32 1.442695, %v1365_v61  ;;  %3173 = vmatpush3.bf16.msra.mxu0 %v3170_v50 }
 0x50b   :  { %3281 = vpow2.f32 %v1369_v62  ;;  %3175 = vmatprep.subr.bf16.mxu0 %v3174_v58 }
 0x50c   :  { %3283 = vpow2.f32 %v1367_v63 }
 0x50d   :  { %v3274_v4 = vpop.eup %3273 }
 0x50e   :  { %v3276_v5 = vpop.eup %3275  ;;  %v1101_v6 = vsel %vm974_vm11, %v3274_v4, 0.0  ;;  %3177 = vmatpush3.bf16.msra.mxu0 %v3174_v58 }
 0x50f   :  { %1102 = vadd.xlane.f32.xlu0 %v1101_v6  ;;  %v1098_v8 = vsel %vm974_vm11, %v3276_v5, 0.0  ;;  %v1755_v6 = vld [vmem:[%s4157_s1 + $0x250] sm:$0xff] }
 0x510   :  { %1099 = vadd.xlane.f32.xlu1 %v1098_v8 }
 0x511   :  { %v3278_v44 = vpop.eup %3277 }
 0x512   :  { %v3280_v10 = vpop.eup %3279  ;;  %v990_v0 = vsel %vm974_vm11, %v3278_v44, 0.0 }
 0x513   :  { %991 = vadd.xlane.f32.xlu0 %v990_v0  ;;  %v987_v1 = vsel %vm974_vm11, %v3280_v10, 0.0 }
 0x514   :  { %988 = vadd.xlane.f32.xlu1 %v987_v1 }
 0x515   :  { %v3282_v12 = vpop.eup %3281 }
 0x516   :  { %v3284_v18 = vpop.eup %3283  ;;  %v1374_v19 = vsel %vm974_vm11, %v3282_v12, 0.0 }
 0x517   :  { %1375 = vadd.xlane.f32.xlu0 %v1374_v19  ;;  %v1371_v20 = vsel %vm974_vm11, %v3284_v18, 0.0  ;;  %v1751_v19 = vld [vmem:[%s4157_s1 + $0x230] sm:$0xff] }
 0x518   :  { %1372 = vadd.xlane.f32.xlu1 %v1371_v20 }
 0x59c   :  { %v1103_v21 = vpop.xlane.xlu0 %1102 }
 0x59d   :  { %3285 = vrcp.f32 %v1103_v21  ;;  %v1100_v23 = vpop.xlane.xlu1 %1099  ;;  %v1752_v21 = vld [vmem:[%s4157_s1 + $0x238] sm:$0xff] }
 0x59e   :  { %3287 = vrcp.f32 %v1100_v23  ;;  %v1753_v23 = vld [vmem:[%s4157_s1 + $0x240] sm:$0xff] }
 0x5a0   :  { %v992_v25 = vpop.xlane.xlu0 %991 }
 0x5a1   :  { %v989_v24 = vpop.xlane.xlu1 %988 }
 0x5a2   :  { %3289 = vrcp.f32 %v989_v24  ;;  %v3848_v24 = vpack.c.bf16 %v1753_v23, %v1752_v21 }
 0x5a3   :  { %3291 = vrcp.f32 %v992_v25  ;;  %v2737_v25 = vld [vmem:[%s4157_s1 + $0x220] ss:$0 sm:$0xff] }
 0x5a4   :  { %v1376_v39 = vpop.xlane.xlu0 %1375 }
 0x5a5   :  { %v1373_v26 = vpop.xlane.xlu1 %1372 }
 0x5a6   :  { %3293 = vrcp.f32 %v1373_v26 }
 0x5a7   :  { %v3286_v27 = vpop.eup %3285  ;;  %3295 = vrcp.f32 %v1376_v39 }
 0x5a8   :  { %v3288_v28 = vpop.eup %3287  ;;  %v1107_v30 = vmul.f32 %v3286_v27, %v3274_v4 }
 0x5a9   :  { %v1106_v29 = vmul.f32 %v3288_v28, %v3276_v5  ;;  %v1754_v5 = vld [vmem:[%s4157_s1 + $0x248] sm:$0xff] }
 0x5aa   :  { %v3812_v8 = vpack.c.bf16 %v1755_v6, %v1754_v5 }
 0x5ab   :  { %2961 = vmatprep.mubr.msk.f32.mxu1 %vm974_vm11, %v1106_v29 }
 0x5ac   :  { %v3290_v35 = vpop.eup %3289  ;;  %2962 = vmatmul.mubr.msk.f32.vlgmr.msra.gmra.mrb[8].mxu1 %vm974_vm11, %v1107_v30  ;;  %3179 = vmatprep.subr.bf16.mxu0 %v3812_v8  ;;  %v3860_v30 = vld [vmem:[%s4157_s1 + $0x268] ss:$0 sm:$0xff] }
 0x5ad   :  { %3149 = vmatpush3.bf16.msra.mxu1 %v3690_v7  ;;  %v995_v36 = vmul.f32 %v3290_v35, %v3280_v10  ;;  %v3292_v37 = vpop.eup %3291  ;;  %v1757_v10 = vld [vmem:[%s4157_s1 + $0x260] sm:$0xff] }
 0x5ae   :  { %3157 = vmatprep.subr.bf16.mxu1 %v3694_v45  ;;  %v996_v40 = vmul.f32 %v3292_v37, %v3278_v44  ;;  %v1756_v44 = vld [vmem:[%s4157_s1 + $0x258] sm:$0xff] }
 0x5af   :  { %2968 = vmatprep.mubr.msk.f32.mxu1 %vm974_vm11, %v995_v36 }
 0x5b0   :  { %v3294_v38 = vpop.eup %3293 }
 0x5b1   :  { %v1379_v41 = vmul.f32 %v3294_v38, %v3284_v18  ;;  %v3296_v7 = vpop.eup %3295  ;;  %v1750_v18 = vld [vmem:[%s4157_s1 + $0x228] sm:$0xff] }
 0x5b2   :  { %v1380_v31 = vmul.f32 %v3296_v7, %v3282_v12  ;;  %v3821_v12 = vpack.c.bf16 %v1757_v10, %v1756_v44  ;;  %v3835_v20 = vpack.c.bf16 %v1751_v19, %v1750_v18 }
 0x5b4   :  { %2969 = vmatmul.mubr.msk.f32.vlgmr.msra.gmra.mrb[8].mxu1 %vm974_vm11, %v996_v40 }
 0x5b5   :  { %3159 = vmatpush3.bf16.msra.mxu1 %v3694_v45  ;;  %2982 = vmatprep.mubr.msk.f32.mxu1 %vm974_vm11, %v1379_v41  ;;  %v1471_v45 = vmul.f32 %v3681_v56, %v3718_v17 }
 0x5b6   :  { %3162 = vmatprep.subr.msk.bf16.mxu1 %vm3700_vm10, %v3704_v14 }
 0x5bc   :  { %2983 = vmatmul.mubr.msk.f32.vlgmr.msra.gmra.mrb[8].mxu1 %vm974_vm11, %v1380_v31 }
 0x5bd   :  { %2989 = vmatprep.mubr.msk.f32.mxu1 %vm579_vm9, %v1470_v32 }
 0x5be   :  { %3165 = vmatpush3.bf16.xpose.msk.msra.mxu1 %vm3700_vm10, %v3704_v14 }
 0x5bf   :  { %3167 = vmatprep.subr.bf16.mxu1 %v3696_v11 }
 0x5c5   :  { %2990 = vmatmul.mubr.msk.f32.vlgmr.msra.gmra.mrb[10].mxu1 %vm579_vm9, %v1471_v45 }
 0x5c6   :  { %3169 = vmatpush3.bf16.msra.mxu1 %v3696_v11 }
 0x698   :  { %v2991_v46 = vpop.f32.mrb[10].mxu1 }
 0x699   :  { %v1550_v49 = vadd.f32 %v2991_v46, %v3738_v15  ;;  %v1544_v47 = vpop.f32.mrb[11].mxu1 }
 0x69a   :  { %v1545_v48 = vadd.f32 %v1544_v47, %v3743_v16 }
 0x69b   :  { %v1556_v51 = vsel %vm974_vm11, %v1550_v49, -inf }
 0x69c   :  { %1557 = vmax.xlane.f32.xlu0 %v1556_v51  ;;  %v1553_v13 = vsel %vm974_vm11, %v1545_v48, -inf }
 0x69d   :  { %1554 = vmax.xlane.f32.xlu1 %v1553_v13 }
 0x729   :  { %v1558_v14 = vpop.xlane.xlu0 %1557 }
 0x72a   :  { %v1560_v33 = vsub.f32 %v1550_v49, %v1558_v14  ;;  %v1555_v22 = vpop.xlane.xlu1 %1554 }
 0x72b   :  { %v1559_v56 = vsub.f32 %v1545_v48, %v1555_v22 }
 0x72c   :  { %v1563_v17 = vmul.f32 1.442695, %v1560_v33 }
 0x72d   :  { %v1561_v34 = vmul.f32 1.442695, %v1559_v56 }
 0x72e   :  { %3297 = vpow2.f32 %v1563_v17 }
 0x72f   :  { %3299 = vpow2.f32 %v1561_v34 }
 0x738   :  { %v3298_v11 = vpop.eup %3297 }
 0x739   :  { %v3300_v42 = vpop.eup %3299  ;;  %v1568_v15 = vsel %vm974_vm11, %v3298_v11, 0.0 }
 0x73a   :  { %1569 = vadd.xlane.f32.xlu0 %v1568_v15  ;;  %v1565_v16 = vsel %vm974_vm11, %v3300_v42, 0.0 }
 0x73b   :  { %1566 = vadd.xlane.f32.xlu1 %v1565_v16 }
 0x7c7   :  { %v1570_v59 = vpop.xlane.xlu0 %1569 }
 0x7c8   :  { %3301 = vrcp.f32 %v1570_v59  ;;  %v1567_v60 = vpop.xlane.xlu1 %1566 }
 0x7c9   :  { %3303 = vrcp.f32 %v1567_v60 }
 0x7d2   :  { %v3302_v61 = vpop.eup %3301 }
 0x7d3   :  { %v3304_v62 = vpop.eup %3303  ;;  %v1574_v4 = vmul.f32 %v3302_v61, %v3298_v11 }
 0x7d4   :  { %v1573_v63 = vmul.f32 %v3304_v62, %v3300_v42  ;;  %v1947_v42 = vld [vmem:[%s4157_s1 + $0x270] sm:$0xff] }
 0x7d6   :  { %2996 = vmatprep.mubr.msk.f32.mxu1 %vm974_vm11, %v1573_v63  ;;  %v1977_v63 = vld [vmem:[%s4157_s1 + $0x2a0] sm:$0xff] }
 0x7d7   :  { %2997 = vmatmul.mubr.msk.f32.vlgmr.msra.gmra.mrb[8].mxu1 %vm974_vm11, %v1574_v4  ;;  %v1988_v4 = vld [vmem:[%s4157_s1 + $0x2b8] sm:$0xff] }
 0x8aa   :  { %v2998_v0 = vpop.f32.mrb[8].mxu1 }
 0x8ab   :  { %v1649_v1 = vpop.f32.mrb[9].mxu1 }
 0x8ac   :  { %3007 = vmatprep.mubr.msk.f32.mxu0 %vm579_vm9, %v1649_v1  ;;  %v1998_v1 = vld [vmem:[%s4157_s1 + $0x2c8] sm:$0xff] }
 0x8ad   :  { %3008 = vmatmul.mubr.msk.f32.vlgmr.msra.gmra.mrb[8].mxu0 %vm579_vm9, %v2998_v0  ;;  %v1987_v0 = vld [vmem:[%s4157_s1 + $0x2b0] sm:$0xff] }
 0x8ae   :  { %3181 = vmatpush3.bf16.msra.mxu0 %v3812_v8  ;;  %3018 = vmatprep.mubr.msk.f32.mxu0 %vm579_vm9, %v3597_v54 }
 0x8af   :  { %3183 = vmatprep.subr.bf16.mxu0 %v3821_v12 }
 0x8b2   :  { %3185 = vmatpush3.bf16.msra.mxu0 %v3821_v12 }
 0x8b3   :  { %3187 = vmatprep.subr.bf16.mxu0 %v3835_v20 }
 0x8b5   :  { %3019 = vmatmul.mubr.msk.f32.vlgmr.msra.gmra.mrb[10].mxu0 %vm579_vm9, %v3595_v52 }
 0x8b6   :  { %3189 = vmatpush3.bf16.msra.mxu0 %v3835_v20 }
 0x8b7   :  { %3191 = vmatprep.subr.bf16.mxu0 %v3848_v24 }
 0x8ba   :  { %3193 = vmatpush3.bf16.msra.mxu0 %v3848_v24 }
 0x980   :  { %v3009_v26 = vpop.f32.mrb[8].mxu0 }
 0x981   :  { %v1741_v27 = vpop.f32.mrb[9].mxu0  ;;  %v1747_v29 = vadd.f32 %v3009_v26, %v2737_v25  ;;  %v2017_v26 = vld [vmem:[%s4157_s1 + $0x2e0] sm:$0xff] }
 0x982   :  { %v1742_v28 = vadd.f32 %v2737_v25, %v1741_v27  ;;  %v1997_v25 = vld [vmem:[%s4157_s1 + $0x2c0] sm:$0xff]  ;;  %v2023_v27 = vld [vmem:[%s4157_s1 + $0x2f0] sm:$0xff] }
 0x984   :  { %3029 = vmatprep.mubr.msk.f32.mxu0 %vm579_vm9, %v1742_v28 }
 0x985   :  { %3030 = vmatmul.mubr.msk.f32.vlgmr.msra.gmra.mrb[10].mxu0 %vm579_vm9, %v1747_v29 }
 0xa58   :  { %v3031_v39 = vpop.f32.mrb[10].mxu0 }
 0xa59   :  { %v1926_v35 = vadd.f32 %v3031_v39, %v3860_v30  ;;  %v1911_v36 = vpop.f32.mrb[11].mxu0 }
 0xa5a   :  { %v1925_v37 = vadd.f32 %v3860_v30, %v1911_v36  ;;  %v2029_v36 = vld [vmem:[%s4157_s1 + $0x300] sm:$0xff] }
 0xa5b   :  { %v2746_v38 = vmul.f32 -1.442695, %v1926_v35 }
 0xa5c   :  { %v2745_v40 = vmul.f32 -1.442695, %v1925_v37  ;;  %v2035_v37 = vld [vmem:[%s4157_s1 + $0x310] sm:$0xff] }
 0xa5d   :  { %3305 = vpow2.f32 %v2746_v38  ;;  %v2041_v38 = vld [vmem:[%s4157_s1 + $0x320] sm:$0xff] }
 0xa5e   :  { %3307 = vpow2.f32 %v2745_v40 }
 0xa67   :  { %v3306_v41 = vpop.eup %3305 }
 0xa68   :  { %v3308_v7 = vpop.eup %3307  ;;  %v1934_v31 = vadd.f32 1.0, %v3306_v41 }
 0xa69   :  { %v1933_v32 = vadd.f32 1.0, %v3308_v7 }
 0xa6a   :  { %3309 = vrcp.f32 %v1934_v31 }
 0xa6b   :  { %3311 = vrcp.f32 %v1933_v32 }
 0xa74   :  { %v3310_v45 = vpop.eup %3309 }
 0xa75   :  { %v3312_v46 = vpop.eup %3311  ;;  %v1942_v49 = vsub.f32 1.0, %v3310_v45  ;;  %v1940_v48 = vmul.f32 %v3310_v45, %v1747_v29  ;;  %v2007_v45 = vld [vmem:[%s4157_s1 + $0x2d0] sm:$0xff] }
 0xa76   :  { %v1941_v47 = vsub.f32 1.0, %v3312_v46  ;;  %v1939_v13 = vmul.f32 %v3312_v46, %v1742_v28  ;;  %v2008_v46 = vld [vmem:[%s4157_s1 + $0x2d8] sm:$0xff] }
 0xa77   :  { %v1944_v51 = vmul.f32 %v3595_v52, %v1942_v49 }
 0xa78   :  { %v1943_v14 = vmul.f32 %v3597_v54, %v1941_v47  ;;  %v1957_v54 = vld [vmem:[%s4157_s1 + $0x280] sm:$0xff] }
 0xa79   :  { %v3866_v33 = vadd.f32 %v1944_v51, %v1940_v48  ;;  %v2047_v51 = vld [vmem:[%s4157_s1 + $0x330] sm:$0xff] }
 0xa7a   :  { %v3868_v22 = vadd.f32 %v1943_v14, %v1939_v13 }
 0xa7b   :  { %v1950_v56 = vrot.slane %v3866_v33, 1  ;;  %v1960_v17 = vrot.slane %v3866_v33, 2  ;;  %v1970_v34 = vrot.slane %v3866_v33, 3  ;;  %v1980_v11 = vrot.slane %v3866_v33, 4 }
 0xa7c   :  { %v1949_v52 = vrot.slane %v3868_v22, 1  ;;  %v1959_v15 = vrot.slane %v3868_v22, 2  ;;  %v1969_v16 = vrot.slane %v3868_v22, 3  ;;  %v1979_v43 = vrot.slane %v3868_v22, 4 }
 0xa7d   :  { %v1989_v55 = vrot.slane %v3868_v22, 5  ;;  %v1990_v50 = vrot.slane %v3866_v33, 5  ;;  %v1999_v57 = vrot.slane %v3868_v22, 6  ;;  %v2000_v58 = vrot.slane %v3866_v33, 6 }
 0xa7e   :  { %v3893_v59 = vsel %vm31_vm0, %v1949_v52, %v1950_v56  ;;  %v3897_v60 = vsel %vm31_vm0, %v1950_v56, %v1949_v52  ;;  %v1961_v61 = vsel %vm42_vm1, %v1959_v15, %v1960_v17  ;;  %v3903_v62 = vsel %vm42_vm1, %v1960_v17, %v1959_v15 }
 0xa7f   :  { %v1953_v5 = vmul.f32 %v3897_v60, %v1947_v42  ;;  %v1963_v6 = vmul.f32 %v3903_v62, %v1957_v54  ;;  %v1971_v44 = vsel %vm53_vm2, %v1969_v16, %v1970_v34  ;;  %v3917_v10 = vsel %vm53_vm2, %v1970_v34, %v1969_v16  ;;  %v2053_v34 = vld [vmem:[%s4157_s1 + $0x340] sm:$0xff]  ;;  %v1948_v16 = vld [vmem:[%s4157_s1 + $0x278] sm:$0xff] }
 0xa80   :  { %v1973_v18 = vmul.f32 %v3917_v10, %v1967_v53  ;;  %v1981_v19 = vsel %vm64_vm3, %v1979_v43, %v1980_v11  ;;  %v3930_v21 = vsel %vm64_vm3, %v1980_v11, %v1979_v43  ;;  %v1991_v23 = vsel %vm75_vm4, %v1989_v55, %v1990_v50  ;;  %v2059_v11 = vld [vmem:[%s4157_s1 + $0x350] sm:$0xff]  ;;  %v1958_v43 = vld [vmem:[%s4157_s1 + $0x288] sm:$0xff] }
 0xa81   :  { %v1983_v28 = vmul.f32 %v3930_v21, %v1977_v63  ;;  %v3946_v29 = vsel %vm75_vm4, %v1990_v50, %v1989_v55  ;;  %v1994_v39 = vmul.f32 %v1991_v23, %v1988_v4  ;;  %v2001_v35 = vsel %vm86_vm6, %v1999_v57, %v2000_v58  ;;  %v2018_v63 = vld [vmem:[%s4157_s1 + $0x2e8] sm:$0xff] }
 0xa82   :  { %v1993_v40 = vmul.f32 %v3946_v29, %v1987_v0  ;;  %v2002_v41 = vsel %vm86_vm6, %v2000_v58, %v1999_v57  ;;  %v2004_v7 = vmul.f32 %v2001_v35, %v1998_v1  ;;  %v2009_v31 = vrot.slane %v3868_v22, 7  ;;  %v1968_v58 = vld [vmem:[%s4157_s1 + $0x298] sm:$0xff] }
 0xa83   :  { %v2003_v32 = vmul.f32 %v2002_v41, %v1997_v25  ;;  %v2010_v49 = vrot.slane %v3866_v33, 7  ;;  %v2019_v47 = vmul.f32 %v2017_v26, %v3868_v22  ;;  %v2025_v48 = vmul.f32 %v2023_v27, %v3893_v59  ;;  %v2024_v1 = vld [vmem:[%s4157_s1 + $0x2f8] sm:$0xff] }
 0xa84   :  { %v1995_v13 = vadd.f32 %v1993_v40, %v1953_v5  ;;  %v2031_v14 = vmul.f32 %v2029_v36, %v1961_v61  ;;  %v2037_v56 = vmul.f32 %v2035_v37, %v1971_v44  ;;  %v2043_v17 = vmul.f32 %v2041_v38, %v1981_v19 }
 0xa85   :  { %v2005_v42 = vadd.f32 %v2003_v32, %v1963_v6  ;;  %v2011_v52 = vsel %vm97_vm7, %v2009_v31, %v2010_v49  ;;  %v2012_v54 = vsel %vm97_vm7, %v2010_v49, %v2009_v31  ;;  %v2021_v15 = vadd.f32 %v2019_v47, %v1983_v28  ;;  %v2030_v28 = vld [vmem:[%s4157_s1 + $0x308] sm:$0xff] }
 0xa86   :  { %v2013_v53 = vmul.f32 %v2012_v54, %v2007_v45  ;;  %v2014_v55 = vmul.f32 %v2011_v52, %v2008_v46  ;;  %v2027_v50 = vadd.f32 %v2025_v48, %v1995_v13  ;;  %v2049_v57 = vmul.f32 %v2047_v51, %v1991_v23 }
 0xa87   :  { %v2033_v4 = vadd.f32 %v2031_v14, %v2005_v42  ;;  %v2045_v5 = vadd.f32 %v2043_v17, %v2021_v15  ;;  %v2055_v6 = vmul.f32 %v2053_v34, %v2001_v35  ;;  %v2061_v0 = vmul.f32 %v2059_v11, %v2011_v52  ;;  %v2036_v35 = vld [vmem:[%s4157_s1 + $0x318] sm:$0xff] }
 0xa88   :  { %v2015_v23 = vadd.f32 %v2013_v53, %v1973_v18  ;;  %v2051_v25 = vadd.f32 %v2049_v57, %v2027_v50  ;;  %v1954_v26 = vmul.f32 %v3893_v59, %v1948_v16  ;;  %v1964_v27 = vmul.f32 %v1961_v61, %v1958_v43  ;;  %v2042_v18 = vld [vmem:[%s4157_s1 + $0x328] sm:$0xff] }
 0xa89   :  { %v2057_v36 = vadd.f32 %v2055_v6, %v2033_v4  ;;  %v1974_v37 = vmul.f32 %v1971_v44, %v1968_v58  ;;  %v1984_v38 = vmul.f32 %v1981_v19, %v1978_v9  ;;  %v2020_v40 = vmul.f32 %v2018_v63, %v3866_v33  ;;  %v2048_v44 = vld [vmem:[%s4157_s1 + $0x338] sm:$0xff]  ;;  %v2054_v19 = vld [vmem:[%s4157_s1 + $0x348] sm:$0xff] }
 0xa8a   :  { %v2039_v31 = vadd.f32 %v2037_v56, %v2015_v23  ;;  %v1996_v59 = vadd.f32 %v1994_v39, %v1954_v26  ;;  %v2006_v61 = vadd.f32 %v2004_v7, %v1964_v27  ;;  %v2026_v32 = vmul.f32 %v2024_v1, %v3897_v60  ;;  %v2060_v39 = vld [vmem:[%s4157_s1 + $0x358] sm:$0xff]  ;;  %v2122_v27 = vld [vmem:[%s4157_s1 + $0x388] sm:$0xff] }
 0xa8b   :  { %v2065_v45 = vadd.f32 %v2057_v36, %v2051_v25  ;;  %v2016_v46 = vadd.f32 %v2014_v55, %v1974_v37  ;;  %v2022_v49 = vadd.f32 %v2020_v40, %v1984_v38  ;;  %v2032_v47 = vmul.f32 %v2030_v28, %v3903_v62  ;;  %v2747_v62 = vld [vmem:[%s4157_s1 + $0x360] ss:$0 sm:$0xff]  ;;  %v2120_v23 = vld [vmem:[%s4157_s1 + $0x378] sm:$0xff]  ;;  %v2123_v28 = vld [vmem:[%s4157_s1 + $0x390] sm:$0xff] }
 0xa8c   :  { %v2063_v7 = vadd.f32 %v2061_v0, %v2039_v31  ;;  %v2028_v48 = vadd.f32 %v2026_v32, %v1996_v59  ;;  %v2038_v60 = vmul.f32 %v2036_v35, %v3917_v10  ;;  %v2044_v51 = vmul.f32 %v2042_v18, %v3930_v21  ;;  %v2121_v25 = vld [vmem:[%s4157_s1 + $0x380] sm:$0xff]  ;;  %v2211_v38 = vld [vmem:[%s4157_s1 + $0x3a8] sm:$0xff] }
 0xa8d   :  { %v2034_v13 = vadd.f32 %v2032_v47, %v2006_v61  ;;  %v2050_v14 = vmul.f32 %v2048_v44, %v3946_v29  ;;  %v2056_v56 = vmul.f32 %v2054_v19, %v2002_v41  ;;  %v2062_v42 = vmul.f32 %v2060_v39, %v2012_v54  ;;  %v2210_v37 = vld [vmem:[%s4157_s1 + $0x3a0] sm:$0xff]  ;;  %v2748_v19 = vld [vmem:[%s4157_s1 + $0x368] ss:$0 sm:$0xff] }
 0xa8e   :  { %v2067_v17 = vadd.f32 %v2063_v7, %v2045_v5  ;;  %v2040_v34 = vadd.f32 %v2038_v60, %v2016_v46  ;;  %v2046_v11 = vadd.f32 %v2044_v51, %v2022_v49  ;;  %v3194_v26 = vpack.c.bf16 %v2121_v25, %v2120_v23  ;;  %v2749_v46 = vld [vmem:[%s4157_s1 + $0x370] ss:$0 sm:$0xff]  ;;  %v2213_v60 = vld [vmem:[%s4157_s1 + $0x3b8] sm:$0xff]  ;;  %v2758_v25 = vld [vmem:[%s4157_s1 + $0x408] ss:$0 sm:$0xff] }
 0xa8f   :  { %v2052_v52 = vadd.f32 %v2050_v14, %v2028_v48  ;;  %v2058_v15 = vadd.f32 %v2056_v56, %v2034_v13  ;;  %v3198_v36 = vpack.c.bf16 %v2123_v28, %v2122_v27  ;;  %v3202_v40 = vpack.c.bf16 %v2211_v38, %v2210_v37  ;;  %v2212_v48 = vld [vmem:[%s4157_s1 + $0x3b0] sm:$0xff]  ;;  %v2588_v38 = vld [vmem:[%s4157_s1 + $0x418] sm:$0xff] }
 0xa90   :  { %v2069_v16 = vadd.f32 %v2067_v17, %v2065_v45  ;;  %v2064_v43 = vadd.f32 %v2062_v42, %v2040_v34  ;;  %3195 = vmatprep.subr.bf16.mxu1 %v3194_v26  ;;  %v3206_v14 = vpack.c.bf16 %v2213_v60, %v2212_v48  ;;  %v2309_v56 = vld [vmem:[%s4157_s1 + $0x3d0] sm:$0xff]  ;;  %v2310_v17 = vld [vmem:[%s4157_s1 + $0x3d8] sm:$0xff] }
 0xa91   :  { %v2066_v53 = vadd.f32 %v2058_v15, %v2052_v52  ;;  %3197 = vmatpush3.bf16.msra.mxu1 %v3194_v26  ;;  %v2315_v52 = vld [vmem:[%s4157_s1 + $0x400] sm:$0xff]  ;;  %v2587_v37 = vld [vmem:[%s4157_s1 + $0x410] sm:$0xff] }
 0xa92   :  { %v2076_v10 = vadd.f32 %v2747_v62, %v2069_v16  ;;  %v2068_v55 = vadd.f32 %v2064_v43, %v2046_v11  ;;  %3199 = vmatprep.subr.bf16.mxu1 %v3198_v36  ;;  %v2313_v11 = vld [vmem:[%s4157_s1 + $0x3f0] sm:$0xff] }
 0xa94   :  { %v4032_v21 = vsub.f32 %v3868_v22, %v2076_v10  ;;  %v2070_v29 = vadd.f32 %v2068_v55, %v2066_v53  ;;  %v2753_v53 = vld [vmem:[%s4157_s1 + $0x3c0] ss:$0 sm:$0xff] }
 0xa95   :  { %3201 = vmatpush3.bf16.msra.mxu1 %v3198_v36 }
 0xa96   :  { %v2082_v41 = vsel %vm579_vm9, %v4032_v21, 0.0  ;;  %v2077_v50 = vadd.f32 %v2747_v62, %v2070_v29  ;;  %3203 = vmatprep.subr.bf16.mxu1 %v3202_v40  ;;  %v2314_v62 = vld [vmem:[%s4157_s1 + $0x3f8] sm:$0xff] }
 0xa97   :  { %2083 = vadd.xlane.f32.xlu1 %v2082_v41  ;;  %v3222_v15 = vpack.c.bf16 %v2315_v52, %v2314_v62 }
 0xa98   :  { %v4037_v54 = vsub.f32 %v3866_v33, %v2077_v50 }
 0xa9a   :  { %v2085_v57 = vsel %vm579_vm9, %v4037_v54, 0.0 }
 0xa9b   :  { %2086 = vadd.xlane.f32.xlu0 %v2085_v57 }
 0xb24   :  { %v2084_v58 = vpop.xlane.xlu1 %2083 }
 0xb25   :  { %v2088_v9 = vmul.f32 0.03125, %v2084_v58 }
 0xb27   :  { %v2090_v63 = vsub.f32 %v4032_v21, %v2088_v9 }
 0xb28   :  { %v2087_v4 = vpop.xlane.xlu0 %2086 }
 0xb29   :  { %v2089_v22 = vmul.f32 0.03125, %v2087_v4  ;;  %v2092_v5 = vmul.f32 %v2090_v63, %v2090_v63 }
 0xb2b   :  { %v2091_v6 = vsub.f32 %v4037_v54, %v2089_v22  ;;  %v2094_v0 = vsel %vm579_vm9, %v2092_v5, 0.0  ;;  %v2750_v22 = vld [vmem:[%s4157_s1 + $0x398] ss:$0 sm:$0xff] }
 0xb2c   :  { %2095 = vadd.xlane.f32.xlu1 %v2094_v0 }
 0xb2d   :  { %v2093_v1 = vmul.f32 %v2091_v6, %v2091_v6 }
 0xb2f   :  { %v2097_v33 = vsel %vm579_vm9, %v2093_v1, 0.0 }
 0xb30   :  { %2098 = vadd.xlane.f32.xlu0 %v2097_v33 }
 0xbb9   :  { %v2096_v35 = vpop.xlane.xlu1 %2095 }
 0xbba   :  { %v2100_v18 = vmul.f32 0.03125, %v2096_v35  ;;  %v3242_v35 = vpack.c.bf16 %v2588_v38, %v2587_v37 }
 0xbbc   :  { %v2102_v31 = vadd.f32 1e-05, %v2100_v18  ;;  %v2590_v18 = vld [vmem:[%s4157_s1 + $0x428] sm:$0xff] }
 0xbbd   :  { %v2099_v59 = vpop.xlane.xlu0 %2098 }
 0xbbe   :  { %3313 = vrsqrt.f32 %v2102_v31  ;;  %v2101_v61 = vmul.f32 0.03125, %v2099_v59 }
 0xbc0   :  { %v2103_v32 = vadd.f32 1e-05, %v2101_v61 }
 0xbc2   :  { %3315 = vrsqrt.f32 %v2103_v32 }
 0xbc8   :  { %v3314_v44 = vpop.eup %3313 }
 0xbc9   :  { %v2106_v45 = vmul.f32 %v3314_v44, %v2090_v63 }
 0xbcb   :  { %v2112_v49 = vmul.f32 %v2748_v19, %v2106_v45 }
 0xbcc   :  { %v3316_v47 = vpop.eup %3315 }
 0xbcd   :  { %v2107_v39 = vmul.f32 %v3316_v47, %v2091_v6  ;;  %v2118_v7 = vadd.f32 %v2749_v46, %v2112_v49 }
 0xbcf   :  { %v2113_v51 = vmul.f32 %v2748_v19, %v2107_v39  ;;  %3040 = vmatprep.mubr.msk.f32.mxu1 %vm579_vm9, %v2118_v7 }
 0xbd1   :  { %v2119_v13 = vadd.f32 %v2749_v46, %v2113_v51 }
 0xbd3   :  { %3041 = vmatmul.mubr.msk.f32.vlgmr.msra.gmra.mrb[12].mxu1 %vm579_vm9, %v2119_v13 }
 0xbd4   :  { %3205 = vmatpush3.bf16.msra.mxu1 %v3202_v40  ;;  %3051 = vmatprep.mubr.msk.f32.mxu1 %vm579_vm9, %v2118_v7  ;;  %v2589_v40 = vld [vmem:[%s4157_s1 + $0x420] sm:$0xff] }
 0xbd5   :  { %3207 = vmatprep.subr.bf16.mxu1 %v3206_v14  ;;  %v3246_v31 = vpack.c.bf16 %v2590_v18, %v2589_v40 }
 0xbd8   :  { %3209 = vmatpush3.bf16.msra.mxu1 %v3206_v14 }
 0xbd9   :  { %3227 = vmatprep.subr.bf16.mxu1 %v3812_v8 }
 0xbdb   :  { %3052 = vmatmul.mubr.msk.f32.vlgmr.msra.gmra.mrb[14].mxu1 %vm579_vm9, %v2119_v13 }
 0xbdc   :  { %3229 = vmatpush3.bf16.msra.mxu1 %v3812_v8  ;;  %3081 = vmatprep.mubr.msk.f32.mxu1 %vm579_vm9, %v4032_v21  ;;  %v2308_v8 = vld [vmem:[%s4157_s1 + $0x3c8] sm:$0xff] }
 0xbdd   :  { %3231 = vmatprep.subr.bf16.mxu1 %v3821_v12 }
 0xbe0   :  { %3233 = vmatpush3.bf16.msra.mxu1 %v3821_v12  ;;  %v3210_v12 = vpack.c.bf16 %v2309_v56, %v2308_v8 }
 0xbe1   :  { %3235 = vmatprep.subr.bf16.mxu1 %v3835_v20 }
 0xbe2   :  { %3211 = vmatprep.subr.bf16.mxu0 %v3210_v12 }
 0xbe3   :  { %3082 = vmatmul.mubr.msk.f32.vlgmr.msra.gmra.mrb[16].mxu1 %vm579_vm9, %v4037_v54  ;;  %3213 = vmatpush3.bf16.msra.mxu0 %v3210_v12 }
 0xbe4   :  { %3237 = vmatpush3.bf16.msra.mxu1 %v3835_v20  ;;  %v2311_v20 = vld [vmem:[%s4157_s1 + $0x3e0] sm:$0xff] }
 0xbe5   :  { %3239 = vmatprep.subr.bf16.mxu1 %v3848_v24  ;;  %v3214_v34 = vpack.c.bf16 %v2311_v20, %v2310_v17  ;;  %v2767_v17 = vld [vmem:[%s4157_s1 + $0x430] ss:$0 sm:$0xff] }
 0xbe7   :  { %3215 = vmatprep.subr.bf16.mxu0 %v3214_v34 }
 0xbe8   :  { %3241 = vmatpush3.bf16.msra.mxu1 %v3848_v24  ;;  %v2312_v24 = vld [vmem:[%s4157_s1 + $0x3e8] sm:$0xff]  ;;  %3217 = vmatpush3.bf16.msra.mxu0 %v3214_v34 }
 0xbe9   :  { %v3218_v42 = vpack.c.bf16 %v2313_v11, %v2312_v24 }
 0xbeb   :  { %3219 = vmatprep.subr.bf16.mxu0 %v3218_v42 }
 0xbec   :  { %3221 = vmatpush3.bf16.msra.mxu0 %v3218_v42 }
 0xbed   :  { %3223 = vmatprep.subr.bf16.mxu0 %v3222_v15 }
 0xbf0   :  { %3225 = vmatpush3.bf16.msra.mxu0 %v3222_v15 }
 0xbf1   :  { %3243 = vmatprep.subr.bf16.mxu0 %v3242_v35 }
 0xca6   :  { %v3042_v16 = vpop.f32.mrb[12].mxu1 }
 0xca7   :  { %v2201_v43 = vpop.f32.mrb[13].mxu1  ;;  %v2207_v5 = vadd.f32 %v3042_v16, %v2750_v22 }
 0xca8   :  { %v2202_v0 = vadd.f32 %v2750_v22, %v2201_v43 }
 0xcae   :  { %v3053_v10 = vpop.f32.mrb[14].mxu1 }
 0xcaf   :  { %v2291_v55 = vadd.f32 %v3053_v10, %v2753_v53  ;;  %v2285_v29 = vpop.f32.mrb[15].mxu1 }
 0xcb0   :  { %v2286_v41 = vadd.f32 %v2753_v53, %v2285_v29 }
 0xcb1   :  { %v2757_v50 = vmul.f32 -1.442695, %v2291_v55 }
 0xcb2   :  { %v2756_v57 = vmul.f32 -1.442695, %v2286_v41 }
 0xcb3   :  { %3317 = vpow2.f32 %v2757_v50 }
 0xcb4   :  { %3319 = vpow2.f32 %v2756_v57 }
 0xcbd   :  { %v3318_v58 = vpop.eup %3317 }
 0xcbe   :  { %v3320_v9 = vpop.eup %3319  ;;  %v2301_v63 = vadd.f32 1.0, %v3318_v58 }
 0xcbf   :  { %v2300_v4 = vadd.f32 1.0, %v3320_v9 }
 0xcc0   :  { %3321 = vrcp.f32 %v2301_v63 }
 0xcc1   :  { %3323 = vrcp.f32 %v2300_v4 }
 0xcca   :  { %v3322_v6 = vpop.eup %3321 }
 0xccb   :  { %v3324_v1 = vpop.eup %3323  ;;  %v2307_v33 = vmul.f32 %v3322_v6, %v2207_v5 }
 0xccc   :  { %v2306_v23 = vmul.f32 %v3324_v1, %v2202_v0 }
 0xcce   :  { %3070 = vmatprep.mubr.msk.f32.mxu0 %vm2321_vm12, %v2306_v23 }
 0xccf   :  { %3071 = vmatmul.mubr.msk.f32.vlgmr.msra.gmra.mrb[12].mxu0 %vm2321_vm12, %v2307_v33 }
 0xcd0   :  { %3245 = vmatpush3.bf16.msra.mxu0 %v3242_v35 }
 0xcd1   :  { %3247 = vmatprep.subr.bf16.mxu0 %v3246_v31 }
 0xcd4   :  { %3249 = vmatpush3.bf16.msra.mxu0 %v3246_v31 }
 0xda2   :  { %v3072_v26 = vpop.f32.mrb[12].mxu0 }
 0xda3   :  { %v2394_v27 = vpop.f32.mrb[13].mxu0  ;;  %v2400_v36 = vadd.f32 %v3072_v26, %v2758_v25 }
 0xda4   :  { %v2395_v28 = vadd.f32 %v2758_v25, %v2394_v27 }
 0xda6   :  { %3092 = vmatprep.mubr.msk.f32.mxu1 %vm579_vm9, %v2395_v28 }
 0xda7   :  { %3093 = vmatmul.mubr.msk.f32.vlgmr.msra.gmra.mrb[16].mxu1 %vm579_vm9, %v2400_v36 }
 0xe7a   :  { %v3094_v59 = vpop.f32.mrb[16].mxu1 }
 0xe7b   :  { %v2566_v61 = vadd.f32 %v3094_v59, %v3860_v30  ;;  %v2556_v32 = vpop.f32.mrb[17].mxu1 }
 0xe7c   :  { %v2565_v44 = vadd.f32 %v3860_v30, %v2556_v32 }
 0xe7d   :  { %v2766_v19 = vmul.f32 -1.442695, %v2566_v61 }
 0xe7e   :  { %v2765_v45 = vmul.f32 -1.442695, %v2565_v44 }
 0xe7f   :  { %3325 = vpow2.f32 %v2766_v19 }
 0xe80   :  { %3327 = vpow2.f32 %v2765_v45 }
 0xe89   :  { %v3326_v46 = vpop.eup %3325 }
 0xe8a   :  { %v3328_v49 = vpop.eup %3327  ;;  %v2574_v47 = vadd.f32 1.0, %v3326_v46 }
 0xe8b   :  { %v2573_v39 = vadd.f32 1.0, %v3328_v49 }
 0xe8c   :  { %3329 = vrcp.f32 %v2574_v47 }
 0xe8d   :  { %3331 = vrcp.f32 %v2573_v39 }
 0xe96   :  { %v3330_v7 = vpop.eup %3329 }
 0xe97   :  { %v3332_v48 = vpop.eup %3331  ;;  %v2582_v60 = vsub.f32 1.0, %v3330_v7  ;;  %v2580_v30 = vmul.f32 %v3330_v7, %v2400_v36 }
 0xe98   :  { %v2581_v51 = vsub.f32 1.0, %v3332_v48  ;;  %v2579_v14 = vmul.f32 %v3332_v48, %v2395_v28 }
 0xe99   :  { %v2584_v13 = vmul.f32 %v2582_v60, %v4037_v54 }
 0xe9a   :  { %v2583_v8 = vmul.f32 %v2581_v51, %v4032_v21 }
 0xe9b   :  { %v2586_v12 = vadd.f32 %v2584_v13, %v2580_v30 }
 0xe9c   :  { %v2585_v56 = vadd.f32 %v2583_v8, %v2579_v14 }
 0xe9e   :  { %3103 = vmatprep.mubr.msk.f32.mxu0 %vm579_vm9, %v2585_v56 }
 0xe9f   :  { %3104 = vmatmul.mubr.msk.f32.vlgmr.msra.gmra.mrb[14].mxu0 %vm579_vm9, %v2586_v12 }
 0xf72   :  { %v3105_v20 = vpop.f32.mrb[14].mxu0 }
 0xf73   :  { %v2674_v24 = vadd.f32 %v3105_v20, %v2767_v17  ;;  %v2668_v34 = vpop.f32.mrb[15].mxu0 }
 0xf74   :  { %v2669_v11 = vadd.f32 %v2767_v17, %v2668_v34 }
 0xf75   :  { %v2678_v54 = vadd.f32 %v2674_v24, %v3560_v3 }
 0xf76   :  { %v2677_v42 = vadd.f32 %v2669_v11, %v3558_v2 }
 0xf77   :  { %2680 = vst.msk [vmem:[%s4159_s2 + $0x8] sm:$0xff] %vm233_vm8, %v2678_v54 }
 0xf78   :  { %2679 = vst.msk [vmem:[%s4159_s2] sm:$0xff] %vm233_vm8, %v2677_v42 }

</bundles_post_ra>
